<compile_context>
chip_gen: v7x
topology: tpu7x:2x2x1
jax: 0.10.0
libtpu: 0.0.40
codegen_flags: <defaults>
</compile_context>

<pallas_src>
import jax
import jax.numpy as jnp
from jax.experimental import pallas as pl
from jax.experimental.pallas import tpu as pltpu

NUM_CLASSES = 26
C5B = 1024            # feat_5b channels
C_LOCAL = 256         # local_conv_out_channels
H5B, W5B = 8, 4       # feat_5b spatial size implied by AvgPool2d((8,4)) / stripe slicing
NUM_STRIPES = 3
STRIPE_H = 4
STRIPE_STARTS = (0, 2, 4)   # feat_5b[:, :, 0:4], [:, :, 2:6], [:, :, 4:8]
BN_EPS = 1e-5
FC_PAD = 128          # finalfc columns padded 26 -> 128 to keep the matmul N lane-aligned
N_BIG = NUM_STRIPES * C_LOCAL + FC_PAD   # 896 = 7 * 128


# ---------------------------------------------------------------------------
# Fused kernel: one MXU matmul = 3x (1x1 conv 1024->256) + pooled finalfc,
# f32 epilogue = folded BN scale/shift + ReLU, sublane-sum for the pooled head.
# ---------------------------------------------------------------------------
def _fused_pcb_kernel(x_ref, w_ref, scale_ref, shift_ref, fcb_ref,
                      main_ref, stripes_ref):
    # x_ref:      [B*H*W, 1024]  bf16  (channels-last slab)
    # w_ref:      [1024, 896]    bf16  (3*256 conv cols | finalfc^T/32 padded to 128)
    # scale_ref:  [1, 768]       f32   (BN gamma / sqrt(var+eps), per stripe band)
    # shift_ref:  [1, 768]       f32   (conv bias + BN shift folded)
    # fcb_ref:    [1, 26]        f32
    # main_ref:   [B, 26]        f32
    # stripes_ref:[3, B, 16, 256] f32  (stripe s -> rows STRIPE_STARTS[s]*4 : +16)
    bsz = main_ref.shape[0]
    hw = H5B * W5B
    nloc = NUM_STRIPES * C_LOCAL

    # Single MXU pass over the whole module (f32 accumulation).
    y = jnp.dot(x_ref[...], w_ref[...], preferred_element_type=jnp.float32)  # [B*hw, 896]

    # ---- local 1x1 conv + folded BatchNorm (eval) + ReLU, all in f32 ----
    local = jnp.maximum(y[:, :nloc] * scale_ref[...] + shift_ref[...], 0.0)
    local = local.reshape(bsz, hw, nloc)
    for s in range(NUM_STRIPES):                       # static loop
        r0 = STRIPE_STARTS[s] * W5B                    # 0, 8, 16 (sublane-aligned)
        stripes_ref[s] = local[:, r0:r0 + STRIPE_H * W5B,
                               s * C_LOCAL:(s + 1) * C_LOCAL]

    # ---- main head: AvgPool2d((8,4)) + finalfc (1/32 pre-folded into weights) ----
    fc_part = y[:, nloc:].reshape(bsz, hw, FC_PAD)
    pooled = jnp.sum(fc_part, axis=1)                  # [B, 128]
    main_ref[...] = pooled[:, :NUM_CLASSES] + fcb_ref[...]


# ---------------------------------------------------------------------------
# One-time parameter folding (run at model init, NOT per forward).
# ---------------------------------------------------------------------------
def prepare_fused_params(fc_w, fc_b, local_conv_params, param_dtype=jnp.bfloat16):
    conv_cols, scales, shifts = [], [], []
    for conv_w, conv_b, gamma, beta, mean, var in local_conv_params:
        w2d = conv_w.reshape(C_LOCAL, C5B).T                     # [1024, 256]
        s = gamma / jnp.sqrt(var + BN_EPS)                       # BN scale
        sh = (conv_b - mean) * s + beta                          # conv bias + BN shift folded
        conv_cols.append(w2d)
        scales.append(s)
        shifts.append(sh)
    w_conv = jnp.concatenate(conv_cols, axis=1)                  # [1024, 768]
    w_fc = fc_w.T * (1.0 / (H5B * W5B))                          # avg-pool folded into finalfc
    w_fc = jnp.pad(w_fc, ((0, 0), (0, FC_PAD - NUM_CLASSES)))    # pad 26 -> 128 lanes
    w_big = jnp.concatenate([w_conv, w_fc], axis=1).astype(param_dtype)   # [1024, 896]
    scale = jnp.concatenate(scales).reshape(1, NUM_STRIPES * C_LOCAL).astype(jnp.float32)
    shift = jnp.concatenate(shifts).reshape(1, NUM_STRIPES * C_LOCAL).astype(jnp.float32)
    fcb = fc_b.reshape(1, NUM_CLASSES).astype(jnp.float32)
    return w_big, scale, shift, fcb


# ---------------------------------------------------------------------------
# Forward pass (one transpose + one pallas_call).
# ---------------------------------------------------------------------------
def part_base_convolution_forward(feat_5b, fused_params):
    # TODO(synk): BNInception backbone (self.base) is not defined in the source
    # module; feat_5b is taken directly as the kernel input instead.
    w_big, scale, shift, fcb = fused_params
    B = feat_5b.shape[0]
    hw = H5B * W5B

    # Single NCHW -> NHWC transpose + bf16 cast; every head reads this slab.
    x = jnp.transpose(feat_5b, (0, 2, 3, 1)).reshape(B * hw, C5B).astype(w_big.dtype)

    main_pred, stripes = pl.pallas_call(
        _fused_pcb_kernel,
        grid=(1,),
        out_shape=(
            jax.ShapeDtypeStruct((B, NUM_CLASSES), jnp.float32),
            jax.ShapeDtypeStruct((NUM_STRIPES, B, STRIPE_H * W5B, C_LOCAL), jnp.float32),
        ),
        in_specs=[
            pl.BlockSpec(x.shape, lambda i: (0, 0)),
            pl.BlockSpec(w_big.shape, lambda i: (0, 0)),
            pl.BlockSpec(scale.shape, lambda i: (0, 0)),
            pl.BlockSpec(shift.shape, lambda i: (0, 0)),
            pl.BlockSpec(fcb.shape, lambda i: (0, 0)),
        ],
        out_specs=(
            pl.BlockSpec((B, NUM_CLASSES), lambda i: (0, 0)),
            pl.BlockSpec((NUM_STRIPES, B, STRIPE_H * W5B, C_LOCAL),
                         lambda i: (0, 0, 0, 0)),
        ),
        compiler_params=pltpu.CompilerParams(dimension_semantics=("arbitrary",)),
    )(x, w_big, scale, shift, fcb)

    logits_list = [main_pred]
    for s in range(NUM_STRIPES):
        # TODO(synk): SpatialTransformBlock (st_list_5b) is not defined in the
        # source module; the local conv feature map (kept channels-last
        # [B, H, W, C], lane-dense) is appended in its place.
        logits_list.append(stripes[s].reshape(B, STRIPE_H, W5B, C_LOCAL))
    return logits_list


# ---------------------------------------------------------------------------
# Pure-JAX reference (eval-mode BN, same bf16 weight/activation storage as the
# kernel so differences are rounding-only).
# ---------------------------------------------------------------------------
def _reference_forward(feat_5b, fc_w, fc_b, local_conv_params):
    B = feat_5b.shape[0]
    xq = feat_5b.astype(jnp.bfloat16).astype(jnp.float32)
    fc_wq = fc_w.astype(jnp.bfloat16).astype(jnp.float32)
    main_feat = jnp.mean(xq, axis=(2, 3))                         # AvgPool2d((8,4))
    outs = [main_feat @ fc_wq.T + fc_b]
    for s, (conv_w, conv_b, gamma, beta, mean, var) in enumerate(local_conv_params):
        h0 = STRIPE_STARTS[s]
        stripe = jnp.transpose(xq[:, :, h0:h0 + STRIPE_H, :], (0, 2, 3, 1))   # [B,4,4,1024]
        wq = conv_w.reshape(C_LOCAL, C5B).astype(jnp.bfloat16).astype(jnp.float32)
        y = jnp.einsum('bhwc,oc->bhwo', stripe, wq) + conv_b
        y = (y - mean) / jnp.sqrt(var + BN_EPS) * gamma + beta
        outs.append(jnp.maximum(y, 0.0))                          # channels-last
    return outs


if __name__ == "__main__":
    key = jax.random.PRNGKey(0)
    keys = jax.random.split(key, 8)
    B = 2

    feat_5b = jax.random.normal(keys[0], (B, C5B, H5B, W5B), jnp.float32)

    # finalfc: Linear(1024, 26)
    fc_w = 0.02 * jax.random.normal(keys[1], (NUM_CLASSES, C5B), jnp.float32)
    fc_b = 0.02 * jax.random.normal(keys[2], (NUM_CLASSES,), jnp.float32)

    # local_conv_list_5b[i]: Conv2d(1024, 256, 1) + BatchNorm2d(256) + ReLU
    local_conv_params = []
    for s in range(NUM_STRIPES):
        kw = jax.random.split(keys[3 + s], 6)
        conv_w = 0.02 * jax.random.normal(kw[0], (C_LOCAL, C5B, 1, 1), jnp.float32)
        conv_b = 0.02 * jax.random.normal(kw[1], (C_LOCAL,), jnp.float32)
        gamma = 1.0 + 0.1 * jax.random.normal(kw[2], (C_LOCAL,), jnp.float32)
        beta = 0.1 * jax.random.normal(kw[3], (C_LOCAL,), jnp.float32)
        mean = 0.1 * jax.random.normal(kw[4], (C_LOCAL,), jnp.float32)
        var = 1.0 + jax.random.uniform(kw[5], (C_LOCAL,), jnp.float32)
        local_conv_params.append((conv_w, conv_b, gamma, beta, mean, var))

    # One-time parameter folding (init-time, hoisted out of the forward pass).
    fused_params = prepare_fused_params(fc_w, fc_b, local_conv_params)

    logits_list = part_base_convolution_forward(feat_5b, fused_params)
    logits_list = jax.block_until_ready(logits_list)

    assert logits_list[0].shape == (B, NUM_CLASSES)
    for lf in logits_list[1:]:
        assert lf.shape == (B, STRIPE_H, W5B, C_LOCAL)   # channels-last local features

    # Numerical sanity check against the pure-JAX reference.
    ref = _reference_forward(feat_5b, fc_w, fc_b, local_conv_params)
    for got, want in zip(logits_list, ref):
        err = float(jnp.max(jnp.abs(got - want)))
        assert err < 1e-2, f"max abs err {err}"

    print("KERNEL_OK")
</pallas_src>

<mosaic_0001>
module attributes {stable_mosaic.version = 11 : i64} {
  func.func @_fused_pcb_kernel(%arg0: i32, %arg1: memref<64x1024xbf16, #tpu.memory_space<vmem>>, %arg2: memref<1024x896xbf16, #tpu.memory_space<vmem>>, %arg3: memref<1x768xf32, #tpu.memory_space<vmem>>, %arg4: memref<1x768xf32, #tpu.memory_space<vmem>>, %arg5: memref<1x26xf32, #tpu.memory_space<vmem>>, %arg6: memref<2x26xf32, #tpu.memory_space<vmem>>, %arg7: memref<3x2x16x256xf32, #tpu.memory_space<vmem>>) attributes {dimension_semantics = [#tpu.dimension_semantics<arbitrary>], iteration_bounds = array<i64: 1>, scalar_prefetch = 0 : i64, scratch_operands = 0 : i64, tpu.core_type = #tpu.core_type<tc>, window_params = [{pipeline_mode = #tpu.pipeline_mode<synchronous>, transform_indices = @transform_0, window_bounds = array<i64: 64, 1024>}, {pipeline_mode = #tpu.pipeline_mode<synchronous>, transform_indices = @transform_1, window_bounds = array<i64: 1024, 896>}, {pipeline_mode = #tpu.pipeline_mode<synchronous>, transform_indices = @transform_2, window_bounds = array<i64: 1, 768>}, {pipeline_mode = #tpu.pipeline_mode<synchronous>, transform_indices = @transform_3, window_bounds = array<i64: 1, 768>}, {pipeline_mode = #tpu.pipeline_mode<synchronous>, transform_indices = @transform_4, window_bounds = array<i64: 1, 26>}, {pipeline_mode = #tpu.pipeline_mode<synchronous>, transform_indices = @transform_5, window_bounds = array<i64: 2, 26>}, {pipeline_mode = #tpu.pipeline_mode<synchronous>, transform_indices = @transform_6, window_bounds = array<i64: 3, 2, 16, 256>}]} {
    %c0 = arith.constant 0 : index
    %c0_0 = arith.constant 0 : index
    %0 = vector.load %arg1[%c0, %c0_0] : memref<64x1024xbf16, #tpu.memory_space<vmem>>, vector<64x1024xbf16>
    %c0_1 = arith.constant 0 : index
    %c0_2 = arith.constant 0 : index
    %1 = vector.load %arg2[%c0_1, %c0_2] : memref<1024x896xbf16, #tpu.memory_space<vmem>>, vector<1024x896xbf16>
    %cst = arith.constant dense<0.000000e+00> : vector<64x896xf32>
    %2 = tpu.matmul %0, %1, %cst {dimension_numbers = #tpu.dot_dimension_numbers<[1], [0], [0], [1], [0, 0, 1, 1], [], []>} : vector<64x1024xbf16>, vector<1024x896xbf16>, vector<64x896xf32> -> vector<64x896xf32>
    %3 = vector.extract_strided_slice %2 {offsets = [0, 0], sizes = [64, 768], strides = [1, 1]} : vector<64x896xf32> to vector<64x768xf32>
    %c0_3 = arith.constant 0 : index
    %c0_4 = arith.constant 0 : index
    %4 = vector.load %arg3[%c0_3, %c0_4] : memref<1x768xf32, #tpu.memory_space<vmem>>, vector<1x768xf32>
    %5 = vector.broadcast %4 : vector<1x768xf32> to vector<64x768xf32>
    %6 = arith.mulf %3, %5 : vector<64x768xf32>
    %c0_5 = arith.constant 0 : index
    %c0_6 = arith.constant 0 : index
    %7 = vector.load %arg4[%c0_5, %c0_6] : memref<1x768xf32, #tpu.memory_space<vmem>>, vector<1x768xf32>
    %8 = vector.broadcast %7 : vector<1x768xf32> to vector<64x768xf32>
    %9 = arith.addf %6, %8 : vector<64x768xf32>
    %cst_7 = arith.constant 0.000000e+00 : f32
    %10 = vector.broadcast %cst_7 : f32 to vector<64x768xf32>
    %11 = arith.maximumf %9, %10 : vector<64x768xf32>
    %12 = vector.shape_cast %11 : vector<64x768xf32> to vector<2x32x768xf32>
    %13 = vector.extract_strided_slice %12 {offsets = [0, 0, 0], sizes = [2, 16, 256], strides = [1, 1, 1]} : vector<2x32x768xf32> to vector<2x16x256xf32>
    %c0_8 = arith.constant 0 : index
    %c0_9 = arith.constant 0 : index
    %c0_10 = arith.constant 0 : index
    %c0_11 = arith.constant 0 : index
    %14 = vector.load %arg7[%c0_8, %c0_9, %c0_10, %c0_11] : memref<3x2x16x256xf32, #tpu.memory_space<vmem>>, vector<1x2x16x256xf32>
    %15 = vector.shape_cast %14 : vector<1x2x16x256xf32> to vector<2x16x256xf32>
    %16 = vector.shape_cast %13 : vector<2x16x256xf32> to vector<1x2x16x256xf32>
    tpu.vector_store %arg7[%c0_8, %c0_9, %c0_10, %c0_11], %16 {strides = array<i32>} : memref<3x2x16x256xf32, #tpu.memory_space<vmem>>, vector<1x2x16x256xf32>,
    %17 = vector.extract_strided_slice %12 {offsets = [0, 8, 256], sizes = [2, 16, 256], strides = [1, 1, 1]} : vector<2x32x768xf32> to vector<2x16x256xf32>
    %c1 = arith.constant 1 : index
    %c0_12 = arith.constant 0 : index
    %c0_13 = arith.constant 0 : index
    %c0_14 = arith.constant 0 : index
    %18 = vector.load %arg7[%c1, %c0_12, %c0_13, %c0_14] : memref<3x2x16x256xf32, #tpu.memory_space<vmem>>, vector<1x2x16x256xf32>
    %19 = vector.shape_cast %18 : vector<1x2x16x256xf32> to vector<2x16x256xf32>
    %20 = vector.shape_cast %17 : vector<2x16x256xf32> to vector<1x2x16x256xf32>
    tpu.vector_store %arg7[%c1, %c0_12, %c0_13, %c0_14], %20 {strides = array<i32>} : memref<3x2x16x256xf32, #tpu.memory_space<vmem>>, vector<1x2x16x256xf32>,
    %21 = vector.extract_strided_slice %12 {offsets = [0, 16, 512], sizes = [2, 16, 256], strides = [1, 1, 1]} : vector<2x32x768xf32> to vector<2x16x256xf32>
    %c2 = arith.constant 2 : index
    %c0_15 = arith.constant 0 : index
    %c0_16 = arith.constant 0 : index
    %c0_17 = arith.constant 0 : index
    %22 = vector.load %arg7[%c2, %c0_15, %c0_16, %c0_17] : memref<3x2x16x256xf32, #tpu.memory_space<vmem>>, vector<1x2x16x256xf32>
    %23 = vector.shape_cast %22 : vector<1x2x16x256xf32> to vector<2x16x256xf32>
    %24 = vector.shape_cast %21 : vector<2x16x256xf32> to vector<1x2x16x256xf32>
    tpu.vector_store %arg7[%c2, %c0_15, %c0_16, %c0_17], %24 {strides = array<i32>} : memref<3x2x16x256xf32, #tpu.memory_space<vmem>>, vector<1x2x16x256xf32>,
    %25 = vector.extract_strided_slice %2 {offsets = [0, 768], sizes = [64, 128], strides = [1, 1]} : vector<64x896xf32> to vector<64x128xf32>
    %26 = vector.shape_cast %25 : vector<64x128xf32> to vector<2x32x128xf32>
    %cst_18 = arith.constant dense<0.000000e+00> : vector<2x128xf32>
    %27 = vector.multi_reduction <add>, %26, %cst_18 [1] : vector<2x32x128xf32> to vector<2x128xf32>
    %28 = vector.extract_strided_slice %27 {offsets = [0, 0], sizes = [2, 26], strides = [1, 1]} : vector<2x128xf32> to vector<2x26xf32>
    %c0_19 = arith.constant 0 : index
    %c0_20 = arith.constant 0 : index
    %29 = vector.load %arg5[%c0_19, %c0_20] : memref<1x26xf32, #tpu.memory_space<vmem>>, vector<1x26xf32>
    %30 = vector.broadcast %29 : vector<1x26xf32> to vector<2x26xf32>
    %31 = arith.addf %28, %30 : vector<2x26xf32>
    %c0_21 = arith.constant 0 : index
    %c0_22 = arith.constant 0 : index
    %32 = vector.load %arg6[%c0_21, %c0_22] : memref<2x26xf32, #tpu.memory_space<vmem>>, vector<2x26xf32>
    tpu.vector_store %arg6[%c0_21, %c0_22], %31 {strides = array<i32>} : memref<2x26xf32, #tpu.memory_space<vmem>>, vector<2x26xf32>,
    return
  }
  func.func @transform_0(%arg0: i32) -> (i32, i32) {
    %c0_i32 = arith.constant 0 : i32
    %c0_i32_0 = arith.constant 0 : i32
    %c0_i32_1 = arith.constant 0 : i32
    return %c0_i32, %c0_i32_0 : i32, i32
  }
  func.func @transform_1(%arg0: i32) -> (i32, i32) {
    %c0_i32 = arith.constant 0 : i32
    %c0_i32_0 = arith.constant 0 : i32
    %c0_i32_1 = arith.constant 0 : i32
    return %c0_i32, %c0_i32_0 : i32, i32
  }
  func.func @transform_2(%arg0: i32) -> (i32, i32) {
    %c0_i32 = arith.constant 0 : i32
    %c0_i32_0 = arith.constant 0 : i32
    %c0_i32_1 = arith.constant 0 : i32
    return %c0_i32, %c0_i32_0 : i32, i32
  }
  func.func @transform_3(%arg0: i32) -> (i32, i32) {
    %c0_i32 = arith.constant 0 : i32
    %c0_i32_0 = arith.constant 0 : i32
    %c0_i32_1 = arith.constant 0 : i32
    return %c0_i32, %c0_i32_0 : i32, i32
  }
  func.func @transform_4(%arg0: i32) -> (i32, i32) {
    %c0_i32 = arith.constant 0 : i32
    %c0_i32_0 = arith.constant 0 : i32
    %c0_i32_1 = arith.constant 0 : i32
    return %c0_i32, %c0_i32_0 : i32, i32
  }
  func.func @transform_5(%arg0: i32) -> (i32, i32) {
    %c0_i32 = arith.constant 0 : i32
    %c0_i32_0 = arith.constant 0 : i32
    %c0_i32_1 = arith.constant 0 : i32
    return %c0_i32, %c0_i32_0 : i32, i32
  }
  func.func @transform_6(%arg0: i32) -> (i32, i32, i32, i32) {
    %c0_i32 = arith.constant 0 : i32
    %c0_i32_0 = arith.constant 0 : i32
    %c0_i32_1 = arith.constant 0 : i32
    %c0_i32_2 = arith.constant 0 : i32
    %c0_i32_3 = arith.constant 0 : i32
    return %c0_i32, %c0_i32_0, %c0_i32_1, %c0_i32_2 : i32, i32, i32, i32
  }
}

</mosaic_0001>

<bundles_post_ra>
// kernel: tpu_custom_call.1
= control target key start
LH: loop header
LB: loop body
LE: loop exit
PB: predicated region body
PF: predicated region fallthrough
CT: control target
= control target key end

     0   :  { %12 = vsyncpa [#allocation3], 0  ;;  %s6361_s0 = inlined_call_operand.hbm [shape: bf16[64,1024], index: 0, kind: input, shape index: {}]   ;;  %s6362_s1 = inlined_call_operand.hbm [shape: bf16[1024,896], index: 1, kind: input, shape index: {}]   ;;  %s6363_s2 = inlined_call_operand.hbm [shape: f32[1,768], index: 2, kind: input, shape index: {}]   ;;  %s6364_s3 = inlined_call_operand.hbm [shape: f32[1,768], index: 3, kind: input, shape index: {}]   ;;  %s6365_s4 = inlined_call_operand.hbm [shape: f32[1,26], index: 4, kind: input, shape index: {}]   ;;  %s6366_s5 = inlined_call_operand.hbm [shape: f32[2,26], index: 5, kind: output, shape index: {0}]   ;;  %s6367_s6 = inlined_call_operand.hbm [shape: f32[3,2,16,256], index: 6, kind: output, shape index: {1}]  }
   0x1   :  { %13 = vsyncpa [#allocation6], 0 }
   0x2   :  { %14 = vsyncpa [#allocation9], 0 }
   0x3   :  { %15 = vsyncpa [#allocation4], 0 }
   0x4   :  { %16 = vsyncpa [#allocation13], 0  ;;  %s5919_s21 = smov [#allocation5]   ;;  %s5755_s25 = scalar_lea.hbm %s6362_s1, 57344 }
   0x5   :  { %s34_s22 = sshll.u32 %s5919_s21, 4  ;;  %p5756_p0 = scmp.ne.s32.totalorder %s6362_s1, %s5755_s25  ;;  %s35_s22 = int_to_ptr.vmem [resolvable:$true] %s34_s22 }
   0x6   :  { %p5759_p1 = scmp.lt.u32.totalorder %s5755_s25, %s6362_s1 }
   0x8   :  { %p5761_p2 = pnand %p5759_p1, %p5756_p0 }
   0xa   :  { %5764 = shalt.err (!%p5761_p2)
}
   0xb   :  { %s5765_s30 = scalar_lea.vmem %s35_s22, 57344  ;;  %p5770_p4 = scmp.lt.s32.totalorder %s35_s22, %s35_s22 }
   0xc   :  { %p5766_p3 = scmp.ne.s32.totalorder %s35_s22, %s5765_s30  ;;  %p5771_p5 = scmp.lt.s32.totalorder %s5765_s30, %s5765_s30 }
   0xe   :  { %p5772_p6 = por %p5771_p5, %p5770_p4 }
  0x10   :  { %p5773_p7 = pnand %p5772_p6, %p5766_p3 }
  0x12   :  { %5776 = shalt.err (!%p5773_p7)
}
  0x13   :  { %s5920_s7 = smov 448   ;;  %s5921_s8 = smov 28  }
  0x14   :  { %40 = dma.hbm_to_vmem [thread:$0]  %s6362_s1, 57344, %s35_s22, [#allocation6], %s5920_s7, %s5920_s7, %s5921_s8  }
  0x15   :  { %s5922_s11 = smov [#allocation8]   ;;  %s5923_s13 = smov [#allocation2]  }
  0x16   :  { %s57_s12 = sshll.u32 %s5922_s11, 4  ;;  %s22_s14 = sshll.u32 %s5923_s13, 4  ;;  %s58_s12 = int_to_ptr.vmem [resolvable:$true] %s57_s12  ;;  %s23_s14 = int_to_ptr.vmem [resolvable:$true] %s22_s14 }
  0x17   :  { %s5777_s17 = scalar_lea.hbm %s6364_s3, 96 }
  0x18   :  { %p5778_p8 = scmp.ne.s32.totalorder %s6364_s3, %s5777_s17  ;;  %p5781_p9 = scmp.lt.u32.totalorder %s5777_s17, %s6364_s3 }
  0x1a   :  { %p5783_p10 = pnand %p5781_p9, %p5778_p8 }
  0x1c   :  { %5786 = shalt.err (!%p5783_p10)
}
  0x1d   :  { %s5787_s1 = scalar_lea.vmem %s58_s12, 96  ;;  %p5792_p12 = scmp.lt.s32.totalorder %s58_s12, %s58_s12 }
  0x1e   :  { %p5788_p11 = scmp.ne.s32.totalorder %s58_s12, %s5787_s1  ;;  %p5793_p13 = scmp.lt.s32.totalorder %s5787_s1, %s5787_s1 }
  0x20   :  { %p5794_p0 = por %p5793_p13, %p5792_p12 }
  0x22   :  { %p5795_p1 = pnand %p5794_p0, %p5788_p11 }
  0x24   :  { %5798 = shalt.err (!%p5795_p1)
}
  0x25   :  { %60 = dma.hbm_to_vmem [thread:$0]  %s6364_s3, 96, %s58_s12, [#allocation9]  }
  0x26   :  { %s5799_s26 = scalar_lea.hbm %s6361_s0, 4096 }
  0x27   :  { %p5800_p2 = scmp.ne.s32.totalorder %s6361_s0, %s5799_s26  ;;  %p5803_p3 = scmp.lt.u32.totalorder %s5799_s26, %s6361_s0 }
  0x29   :  { %p5805_p4 = pnand %p5803_p3, %p5800_p2 }
  0x2b   :  { %5808 = shalt.err (!%p5805_p4)
}
  0x2c   :  { %s5809_s7 = scalar_lea.vmem %s23_s14, 4096  ;;  %p5814_p6 = scmp.lt.s32.totalorder %s23_s14, %s23_s14 }
  0x2d   :  { %p5810_p5 = scmp.ne.s32.totalorder %s23_s14, %s5809_s7  ;;  %p5815_p7 = scmp.lt.s32.totalorder %s5809_s7, %s5809_s7 }
  0x2f   :  { %p5816_p8 = por %p5815_p7, %p5814_p6 }
  0x31   :  { %p5817_p9 = pnand %p5816_p8, %p5810_p5 }
  0x33   :  { %5820 = shalt.err (!%p5817_p9)
}
  0x34   :  { %s5924_s3 = smov 512   ;;  %s5925_s8 = smov 32  }
  0x35   :  { %28 = dma.hbm_to_vmem [thread:$0]  %s6361_s0, 4096, %s23_s14, [#allocation3], %s5924_s3, %s5924_s3, %s5925_s8  }
  0x36   :  { %s5926_s11 = smov [#allocation7]   ;;  %s5927_s13 = smov [#allocation10]  }
  0x37   :  { %s47_s12 = sshll.u32 %s5926_s11, 4  ;;  %s67_s15 = sshll.u32 %s5927_s13, 4  ;;  %s48_s12 = int_to_ptr.vmem [resolvable:$true] %s47_s12  ;;  %s68_s15 = int_to_ptr.vmem [resolvable:$true] %s67_s15 }
  0x38   :  { %s5821_s18 = scalar_lea.hbm %s6363_s2, 96 }
  0x39   :  { %p5822_p10 = scmp.ne.s32.totalorder %s6363_s2, %s5821_s18  ;;  %p5825_p11 = scmp.lt.u32.totalorder %s5821_s18, %s6363_s2 }
  0x3b   :  { %p5827_p12 = pnand %p5825_p11, %p5822_p10 }
  0x3d   :  { %5830 = shalt.err (!%p5827_p12)
}
  0x3e   :  { %s5831_s0 = scalar_lea.vmem %s48_s12, 96  ;;  %p5836_p0 = scmp.lt.s32.totalorder %s48_s12, %s48_s12 }
  0x3f   :  { %p5832_p13 = scmp.ne.s32.totalorder %s48_s12, %s5831_s0  ;;  %p5837_p1 = scmp.lt.s32.totalorder %s5831_s0, %s5831_s0 }
  0x41   :  { %p5838_p2 = por %p5837_p1, %p5836_p0 }
  0x43   :  { %p5839_p3 = pnand %p5838_p2, %p5832_p13 }
  0x45   :  { %5842 = shalt.err (!%p5839_p3)
}
  0x46   :  { %50 = dma.hbm_to_vmem [thread:$0]  %s6363_s2, 96, %s48_s12, [#allocation6]  }
  0x47   :  { %s5843_s25 = scalar_lea.hbm %s6365_s4, 16 }
  0x48   :  { %p5844_p4 = scmp.ne.s32.totalorder %s6365_s4, %s5843_s25  ;;  %p5847_p5 = scmp.lt.u32.totalorder %s5843_s25, %s6365_s4 }
  0x4a   :  { %p5849_p6 = pnand %p5847_p5, %p5844_p4 }
  0x4c   :  { %5852 = shalt.err (!%p5849_p6)
}
  0x4d   :  { %s5853_s30 = scalar_lea.vmem %s68_s15, 16  ;;  %s5857_s7 = scalar_lea.vmem %s68_s15, 32 }
  0x4e   :  { %p5854_p7 = scmp.ne.s32.totalorder %s68_s15, %s5853_s30  ;;  %p5858_p8 = scmp.lt.s32.totalorder %s68_s15, %s68_s15 }
  0x4f   :  { %p5859_p9 = scmp.lt.s32.totalorder %s5857_s7, %s5853_s30 }
  0x51   :  { %p5860_p10 = por %p5859_p9, %p5858_p8 }
  0x53   :  { %p5861_p11 = pnand %p5860_p10, %p5854_p7 }
  0x55   :  { %5864 = shalt.err (!%p5861_p11)
}
  0x56   :  { %70 = dma.hbm_to_vmem [thread:$0]  %s6365_s4, 16, %s68_s15, [#allocation9]  }
  0x57   :  { %5909 = dma.done.wait [#allocation3], 4096  }
  0x58   :  { %5910 = vsyncadd [#allocation3], 4294963200 }
  0x59   :  { %5911 = dma.done.wait [#allocation6], 57440  }
  0x5a   :  { %5912 = vsyncadd [#allocation6], 4294909856 }
  0x5b   :  { %5913 = dma.done.wait [#allocation9], 112  }
  0x5c   :  { %5914 = vsyncadd [#allocation9], 4294967184  ;;  %v5115_v0 = vld [vmem:[#allocation5 + $0x4] ss:$28 sps:$4 sm:$0xff]   ;;  %v5121_v4 = vld [vmem:[#allocation5 + $0x3c] ss:$28 sps:$4 sm:$0xff]  }
  0x5d   :  { %v5117_v1 = vld [vmem:[#allocation5 + $0x384] ss:$28 sps:$4 sm:$0xff]   ;;  %3095 = vmatprep.subr.bf16.mxu1 %v5115_v0  ;;  %v5123_v5 = vld [vmem:[#allocation5 + $0x3bc] ss:$28 sps:$4 sm:$0xff]   ;;  %v5127_v8 = vld [vmem:[#allocation5 + $0x74] ss:$28 sps:$4 sm:$0xff]  }
  0x5e   :  { %v5119_v2 = vld [vmem:[#allocation5] ss:$28 sps:$4 sm:$0xff]   ;;  %3160 = vmatprep.subr.bf16.mxu0 %v5117_v1  ;;  %v5125_v6 = vld [vmem:[#allocation5 + $0x38] ss:$28 sps:$4 sm:$0xff]   ;;  %v5131_v10 = vld [vmem:[#allocation5 + $0x70] ss:$28 sps:$4 sm:$0xff]  }
  0x5f   :  { %v5120_v3 = vld [vmem:[#allocation5 + $0x380] ss:$28 sps:$4 sm:$0xff]   ;;  %3096 = vmatpush1.bf16.msra.mxu1 %v5119_v2  ;;  %v5126_v7 = vld [vmem:[#allocation5 + $0x3b8] ss:$28 sps:$4 sm:$0xff]   ;;  %v5132_v11 = vld [vmem:[#allocation5 + $0x3f0] ss:$28 sps:$4 sm:$0xff]  }
  0x60   :  { %3161 = vmatpush1.bf16.msra.mxu0 %v5120_v3  ;;  %3097 = vmatprep.subr.bf16.mxu1 %v5121_v4  ;;  %v5129_v9 = vld [vmem:[#allocation5 + $0x3f4] ss:$28 sps:$4 sm:$0xff]   ;;  %v5133_v12 = vld [vmem:[#allocation5 + $0xac] ss:$28 sps:$4 sm:$0xff]   ;;  %v5139_v16 = vld [vmem:[#allocation5 + $0xe4] ss:$28 sps:$4 sm:$0xff]  }
  0x61   :  { %3162 = vmatprep.subr.bf16.mxu0 %v5123_v5  ;;  %v5135_v13 = vld [vmem:[#allocation5 + $0x42c] ss:$28 sps:$4 sm:$0xff]   ;;  %v5141_v17 = vld [vmem:[#allocation5 + $0x464] ss:$28 sps:$4 sm:$0xff]   ;;  %v5145_v20 = vld [vmem:[#allocation5 + $0x11c] ss:$28 sps:$4 sm:$0xff]  }
  0x62   :  { %v5137_v14 = vld [vmem:[#allocation5 + $0xa8] ss:$28 sps:$4 sm:$0xff]   ;;  %v5143_v18 = vld [vmem:[#allocation5 + $0xe0] ss:$28 sps:$4 sm:$0xff]   ;;  %v5149_v22 = vld [vmem:[#allocation5 + $0x118] ss:$28 sps:$4 sm:$0xff]  }
  0x63   :  { %3098 = vmatpush1.bf16.msra.mxu1 %v5125_v6  ;;  %v5138_v15 = vld [vmem:[#allocation5 + $0x428] ss:$28 sps:$4 sm:$0xff]   ;;  %v5144_v19 = vld [vmem:[#allocation5 + $0x460] ss:$28 sps:$4 sm:$0xff]   ;;  %v5150_v23 = vld [vmem:[#allocation5 + $0x498] ss:$28 sps:$4 sm:$0xff]  }
  0x64   :  { %3163 = vmatpush1.bf16.msra.mxu0 %v5126_v7  ;;  %3099 = vmatprep.subr.bf16.mxu1 %v5127_v8  ;;  %v5147_v21 = vld [vmem:[#allocation5 + $0x49c] ss:$28 sps:$4 sm:$0xff]   ;;  %v5151_v24 = vld [vmem:[#allocation5 + $0x154] ss:$28 sps:$4 sm:$0xff]   ;;  %v5157_v28 = vld [vmem:[#allocation5 + $0x18c] ss:$28 sps:$4 sm:$0xff]  }
  0x65   :  { %3164 = vmatprep.subr.bf16.mxu0 %v5129_v9  ;;  %v5153_v25 = vld [vmem:[#allocation5 + $0x4d4] ss:$28 sps:$4 sm:$0xff]   ;;  %v5159_v29 = vld [vmem:[#allocation5 + $0x50c] ss:$28 sps:$4 sm:$0xff]   ;;  %v5163_v32 = vld [vmem:[#allocation5 + $0x1c4] ss:$28 sps:$4 sm:$0xff]  }
  0x66   :  { %v5155_v26 = vld [vmem:[#allocation5 + $0x150] ss:$28 sps:$4 sm:$0xff]   ;;  %v5161_v30 = vld [vmem:[#allocation5 + $0x188] ss:$28 sps:$4 sm:$0xff]   ;;  %v5167_v34 = vld [vmem:[#allocation5 + $0x1c0] ss:$28 sps:$4 sm:$0xff]  }
  0x67   :  { %3100 = vmatpush1.bf16.msra.mxu1 %v5131_v10  ;;  %v5156_v27 = vld [vmem:[#allocation5 + $0x4d0] ss:$28 sps:$4 sm:$0xff]   ;;  %v5162_v31 = vld [vmem:[#allocation5 + $0x508] ss:$28 sps:$4 sm:$0xff]   ;;  %v5168_v35 = vld [vmem:[#allocation5 + $0x540] ss:$28 sps:$4 sm:$0xff]  }
  0x68   :  { %3165 = vmatpush1.bf16.msra.mxu0 %v5132_v11  ;;  %3101 = vmatprep.subr.bf16.mxu1 %v5133_v12  ;;  %v5165_v33 = vld [vmem:[#allocation5 + $0x544] ss:$28 sps:$4 sm:$0xff]   ;;  %v5169_v36 = vld [vmem:[#allocation5 + $0x1fc] ss:$28 sps:$4 sm:$0xff]   ;;  %v5175_v40 = vld [vmem:[#allocation5 + $0x234] ss:$28 sps:$4 sm:$0xff]  }
  0x69   :  { %3166 = vmatprep.subr.bf16.mxu0 %v5135_v13  ;;  %v5171_v37 = vld [vmem:[#allocation5 + $0x57c] ss:$28 sps:$4 sm:$0xff]   ;;  %v5177_v41 = vld [vmem:[#allocation5 + $0x5b4] ss:$28 sps:$4 sm:$0xff]   ;;  %v5181_v44 = vld [vmem:[#allocation5 + $0x26c] ss:$28 sps:$4 sm:$0xff]  }
  0x6a   :  { %v5173_v38 = vld [vmem:[#allocation5 + $0x1f8] ss:$28 sps:$4 sm:$0xff]   ;;  %v5179_v42 = vld [vmem:[#allocation5 + $0x230] ss:$28 sps:$4 sm:$0xff]   ;;  %v5185_v46 = vld [vmem:[#allocation5 + $0x268] ss:$28 sps:$4 sm:$0xff]  }
  0x6b   :  { %3102 = vmatpush1.bf16.msra.mxu1 %v5137_v14  ;;  %v5174_v39 = vld [vmem:[#allocation5 + $0x578] ss:$28 sps:$4 sm:$0xff]   ;;  %v5180_v43 = vld [vmem:[#allocation5 + $0x5b0] ss:$28 sps:$4 sm:$0xff]   ;;  %v5186_v47 = vld [vmem:[#allocation5 + $0x5e8] ss:$28 sps:$4 sm:$0xff]  }
  0x6c   :  { %3167 = vmatpush1.bf16.msra.mxu0 %v5138_v15  ;;  %3103 = vmatprep.subr.bf16.mxu1 %v5139_v16  ;;  %v5183_v45 = vld [vmem:[#allocation5 + $0x5ec] ss:$28 sps:$4 sm:$0xff]   ;;  %v87_v48 = vld [vmem:[#allocation2] sm:$0xff]  ;;  %v5193_v58 = vld [vmem:[#allocation5 + $0x2dc] ss:$28 sps:$4 sm:$0xff]   ;;  %s5928_s4 = smov [#allocation12]  }
  0x6d   :  { %3168 = vmatprep.subr.bf16.mxu0 %v5141_v17  ;;  %v91_v49 = vld [vmem:[#allocation2 + $0x20] sm:$0xff]  ;;  %v88_v50 = vld [vmem:[#allocation2 + $0x8] sm:$0xff]  ;;  %v5195_v59 = vld [vmem:[#allocation5 + $0x65c] ss:$28 sps:$4 sm:$0xff]   ;;  %s4347_s8 = sshll.u32 %s5928_s4, 4  ;;  %s4348_s8 = int_to_ptr.vmem [resolvable:$true] %s4347_s8 }
  0x6e   :  { %v92_v51 = vld [vmem:[#allocation2 + $0x28] sm:$0xff]  ;;  %v5187_v52 = vld [vmem:[#allocation5 + $0x2a4] ss:$28 sps:$4 sm:$0xff]   ;;  %v6027_v53 = vcombine.high %v87_v48, %v91_v49  ;;  %v5197_v60 = vld [vmem:[#allocation5 + $0x2d8] ss:$28 sps:$4 sm:$0xff]   ;;  %v6033_v8 = vcombine.low %v87_v48, %v91_v49  ;;  %s5865_s9 = scalar_lea.vmem %s4348_s8, 3072  ;;  %p5870_p13 = scmp.lt.s32.totalorder %s4348_s8, %s4348_s8 }
  0x6f   :  { %3104 = vmatpush1.bf16.msra.mxu1 %v5143_v18  ;;  %v6029_v54 = vcombine.high %v88_v50, %v92_v51  ;;  %v5189_v55 = vld [vmem:[#allocation5 + $0x624] ss:$28 sps:$4 sm:$0xff]   ;;  %v5198_v61 = vld [vmem:[#allocation5 + $0x658] ss:$28 sps:$4 sm:$0xff]   ;;  %v5203_v0 = vld [vmem:[#allocation5 + $0x310] ss:$28 sps:$4 sm:$0xff]   ;;  %v6035_v11 = vcombine.low %v88_v50, %v92_v51  ;;  %p5866_p12 = scmp.ne.s32.totalorder %s4348_s8, %s5865_s9  ;;  %p5871_p0 = scmp.lt.s32.totalorder %s5865_s9, %s5865_s9 }
  0x70   :  { %3169 = vmatpush1.bf16.msra.mxu0 %v5144_v19  ;;  %3105 = vmatprep.subr.bf16.mxu1 %v5145_v20  ;;  %v5191_v56 = vld [vmem:[#allocation5 + $0x2a0] ss:$28 sps:$4 sm:$0xff]   ;;  %v5199_v62 = vld [vmem:[#allocation5 + $0x314] ss:$28 sps:$4 sm:$0xff]   ;;  %v5205_v2 = vld [vmem:[#allocation5 + $0x34c] ss:$28 sps:$4 sm:$0xff]  }
  0x71   :  { %3170 = vmatprep.subr.bf16.mxu0 %v5147_v21  ;;  %3127 = vmatprep.mubr.bf16.mxu1 %v6027_v53  ;;  %v5192_v57 = vld [vmem:[#allocation5 + $0x620] ss:$28 sps:$4 sm:$0xff]   ;;  %v5201_v63 = vld [vmem:[#allocation5 + $0x694] ss:$28 sps:$4 sm:$0xff]   ;;  %v5207_v3 = vld [vmem:[#allocation5 + $0x6cc] ss:$28 sps:$4 sm:$0xff]   ;;  %p5872_p1 = por %p5871_p0, %p5870_p13 }
  0x72   :  { %3192 = vmatprep.mubr.bf16.mxu0 %v6029_v54  ;;  %v5204_v1 = vld [vmem:[#allocation5 + $0x690] ss:$28 sps:$4 sm:$0xff]   ;;  %v5209_v4 = vld [vmem:[#allocation5 + $0x348] ss:$28 sps:$4 sm:$0xff]   ;;  %v5211_v9 = vld [vmem:[#allocation5 + $0x700] ss:$28 sps:$4 sm:$0xff]  }
  0x73   :  { %3106 = vmatpush1.bf16.msra.mxu1 %v5149_v22  ;;  %v5210_v5 = vld [vmem:[#allocation5 + $0x6c8] ss:$28 sps:$4 sm:$0xff]   ;;  %v5219_v12 = vld [vmem:[#allocation5 + $0x73c] ss:$28 sps:$4 sm:$0xff]   ;;  %v5225_v16 = vld [vmem:[#allocation5 + $0x774] ss:$28 sps:$4 sm:$0xff]   ;;  %p5873_p2 = pnand %p5872_p1, %p5866_p12 }
  0x74   :  { %3171 = vmatpush1.bf16.msra.mxu0 %v5150_v23  ;;  %3107 = vmatprep.subr.bf16.mxu1 %v5151_v24  ;;  %v5213_v6 = vld [vmem:[#allocation5 + $0x704] ss:$28 sps:$4 sm:$0xff]   ;;  %v5216_v7 = vld [vmem:[#allocation5 + $0xc] ss:$28 sps:$4 sm:$0xff]   ;;  %v5217_v14 = vld [vmem:[#allocation5 + $0x738] ss:$28 sps:$4 sm:$0xff]  }
  0x75   :  { %3172 = vmatprep.subr.bf16.mxu0 %v5153_v25  ;;  %v5214_v10 = vld [vmem:[#allocation5 + $0x8] ss:$28 sps:$4 sm:$0xff]   ;;  %v5220_v15 = vld [vmem:[#allocation5 + $0x40] ss:$28 sps:$4 sm:$0xff]   ;;  %v5223_v18 = vld [vmem:[#allocation5 + $0x770] ss:$28 sps:$4 sm:$0xff]  }
  0x76   :  { %v5222_v13 = vld [vmem:[#allocation5 + $0x44] ss:$28 sps:$4 sm:$0xff]   ;;  %v5228_v17 = vld [vmem:[#allocation5 + $0x7c] ss:$28 sps:$4 sm:$0xff]   ;;  %v96_v22 = vld [vmem:[#allocation2 + $0x48] sm:$0xff] }
  0x77   :  { %3108 = vmatpush1.bf16.msra.mxu1 %v5155_v26  ;;  %v5226_v19 = vld [vmem:[#allocation5 + $0x78] ss:$28 sps:$4 sm:$0xff]   ;;  %v95_v20 = vld [vmem:[#allocation2 + $0x40] sm:$0xff]  ;;  %v100_v23 = vld [vmem:[#allocation2 + $0x68] sm:$0xff] }
  0x78   :  { %3173 = vmatpush1.bf16.msra.mxu0 %v5156_v27  ;;  %3109 = vmatprep.subr.bf16.mxu1 %v5157_v28  ;;  %v99_v21 = vld [vmem:[#allocation2 + $0x60] sm:$0xff]  ;;  %v5231_v24 = vld [vmem:[#allocation5 + $0x7ac] ss:$28 sps:$4 sm:$0xff]   ;;  %v6043_v27 = vcombine.high %v96_v22, %v100_v23  ;;  %v5234_v28 = vld [vmem:[#allocation5 + $0xb4] ss:$28 sps:$4 sm:$0xff]  }
  0x79   :  { %3174 = vmatprep.subr.bf16.mxu0 %v5159_v29  ;;  %v6039_v25 = vcombine.high %v95_v20, %v99_v21  ;;  %v6041_v26 = vcombine.low %v95_v20, %v99_v21  ;;  %v6045_v29 = vcombine.low %v96_v22, %v100_v23  ;;  %v5249_v48 = vld [vmem:[#allocation5 + $0x854] ss:$28 sps:$4 sm:$0xff]   ;;  %v5252_v49 = vld [vmem:[#allocation5 + $0x15c] ss:$28 sps:$4 sm:$0xff]   ;;  %v111_v50 = vld [vmem:[#allocation2 + $0xc0] sm:$0xff] }
  0x7a   :  { %v115_v51 = vld [vmem:[#allocation2 + $0xe0] sm:$0xff]  ;;  %v5282_v20 = vld [vmem:[#allocation5 + $0x274] ss:$28 sps:$4 sm:$0xff]  }
  0x7b   :  { %3110 = vmatpush1.bf16.msra.mxu1 %v5161_v30  ;;  %v5229_v30 = vld [vmem:[#allocation5 + $0x7a8] ss:$28 sps:$4 sm:$0xff]   ;;  %v5280_v22 = vld [vmem:[#allocation5 + $0x270] ss:$28 sps:$4 sm:$0xff]  }
  0x7c   :  { %3175 = vmatpush1.bf16.msra.mxu0 %v5162_v31  ;;  %3111 = vmatprep.subr.bf16.mxu1 %v5163_v32  ;;  %v5232_v31 = vld [vmem:[#allocation5 + $0xb0] ss:$28 sps:$4 sm:$0xff]   ;;  %v5237_v32 = vld [vmem:[#allocation5 + $0x7e4] ss:$28 sps:$4 sm:$0xff]  }
  0x7d   :  { %3176 = vmatprep.subr.bf16.mxu0 %v5165_v33  ;;  %v5240_v33 = vld [vmem:[#allocation5 + $0xec] ss:$28 sps:$4 sm:$0xff]   ;;  %v5285_v23 = vld [vmem:[#allocation5 + $0x9a4] ss:$28 sps:$4 sm:$0xff]  }
  0x7e   :  { %v5277_v21 = vld [vmem:[#allocation5 + $0x968] ss:$28 sps:$4 sm:$0xff]  }
  0x7f   :  { %3112 = vmatpush1.bf16.msra.mxu1 %v5167_v34  ;;  %v103_v34 = vld [vmem:[#allocation2 + $0x80] sm:$0xff] }
  0x80   :  { %3177 = vmatpush1.bf16.msra.mxu0 %v5168_v35  ;;  %3113 = vmatprep.subr.bf16.mxu1 %v5169_v36  ;;  %v107_v35 = vld [vmem:[#allocation2 + $0xa0] sm:$0xff] }
  0x81   :  { %3178 = vmatprep.subr.bf16.mxu0 %v5171_v37  ;;  %v6051_v36 = vcombine.high %v103_v34, %v107_v35  ;;  %v104_v37 = vld [vmem:[#allocation2 + $0x88] sm:$0xff] }
  0x83   :  { %3114 = vmatpush1.bf16.msra.mxu1 %v5173_v38  ;;  %v108_v38 = vld [vmem:[#allocation2 + $0xa8] sm:$0xff] }
  0x84   :  { %3179 = vmatpush1.bf16.msra.mxu0 %v5174_v39  ;;  %3115 = vmatprep.subr.bf16.mxu1 %v5175_v40  ;;  %v5235_v39 = vld [vmem:[#allocation5 + $0x7e0] ss:$28 sps:$4 sm:$0xff]   ;;  %v5238_v40 = vld [vmem:[#allocation5 + $0xe8] ss:$28 sps:$4 sm:$0xff]  }
  0x85   :  { %3180 = vmatprep.subr.bf16.mxu0 %v5177_v41  ;;  %v6053_v41 = vcombine.low %v103_v34, %v107_v35  ;;  %v5292_v34 = vld [vmem:[#allocation5 + $0x2e0] ss:$28 sps:$4 sm:$0xff]   ;;  %v5297_v35 = vld [vmem:[#allocation5 + $0xa14] ss:$28 sps:$4 sm:$0xff]  }
  0x87   :  { %3116 = vmatpush1.bf16.msra.mxu1 %v5179_v42  ;;  %v6055_v42 = vcombine.high %v104_v37, %v108_v38 }
  0x88   :  { %3181 = vmatpush1.bf16.msra.mxu0 %v5180_v43  ;;  %3117 = vmatprep.subr.bf16.mxu1 %v5181_v44  ;;  %v6057_v43 = vcombine.low %v104_v37, %v108_v38  ;;  %v5243_v44 = vld [vmem:[#allocation5 + $0x81c] ss:$28 sps:$4 sm:$0xff]   ;;  %v5295_v38 = vld [vmem:[#allocation5 + $0xa10] ss:$28 sps:$4 sm:$0xff]  }
  0x89   :  { %3182 = vmatprep.subr.bf16.mxu0 %v5183_v45  ;;  %v5246_v45 = vld [vmem:[#allocation5 + $0x124] ss:$28 sps:$4 sm:$0xff]   ;;  %v5300_v37 = vld [vmem:[#allocation5 + $0x31c] ss:$28 sps:$4 sm:$0xff]  }
  0x8b   :  { %3118 = vmatpush1.bf16.msra.mxu1 %v5185_v46  ;;  %v5241_v46 = vld [vmem:[#allocation5 + $0x818] ss:$28 sps:$4 sm:$0xff]  }
  0x8c   :  { %3183 = vmatpush1.bf16.msra.mxu0 %v5186_v47  ;;  %3119 = vmatprep.subr.bf16.mxu1 %v5187_v52  ;;  %v5244_v47 = vld [vmem:[#allocation5 + $0x120] ss:$28 sps:$4 sm:$0xff]   ;;  %v112_v52 = vld [vmem:[#allocation2 + $0xc8] sm:$0xff] }
  0x8d   :  { %3184 = vmatprep.subr.bf16.mxu0 %v5189_v55  ;;  %v6063_v55 = vcombine.high %v111_v50, %v115_v51 }
  0x8f   :  { %3120 = vmatpush1.bf16.msra.mxu1 %v5191_v56  ;;  %v116_v56 = vld [vmem:[#allocation2 + $0xe8] sm:$0xff] }
  0x90   :  { %3185 = vmatpush1.bf16.msra.mxu0 %v5192_v57  ;;  %3121 = vmatprep.subr.bf16.mxu1 %v5193_v58  ;;  %v6065_v57 = vcombine.high %v112_v52, %v116_v56  ;;  %v5247_v58 = vld [vmem:[#allocation5 + $0x850] ss:$28 sps:$4 sm:$0xff]  }
  0x91   :  { %3186 = vmatprep.subr.bf16.mxu0 %v5195_v59  ;;  %v5250_v59 = vld [vmem:[#allocation5 + $0x158] ss:$28 sps:$4 sm:$0xff]  }
  0x93   :  { %3122 = vmatpush1.bf16.msra.mxu1 %v5197_v60  ;;  %v6068_v60 = vcombine.low %v111_v50, %v115_v51  ;;  %v101_v51 = vld [vmem:[#allocation2 + $0x70] sm:$0xff] }
  0x94   :  { %3187 = vmatpush1.bf16.msra.mxu0 %v5198_v61  ;;  %3123 = vmatprep.subr.bf16.mxu1 %v5199_v62  ;;  %v6070_v61 = vcombine.low %v112_v52, %v116_v56  ;;  %v5255_v62 = vld [vmem:[#allocation5 + $0x88c] ss:$28 sps:$4 sm:$0xff]   ;;  %v5307_v52 = vld [vmem:[#allocation5 + $0xa80] ss:$28 sps:$4 sm:$0xff]  }
  0x95   :  { %3188 = vmatprep.subr.bf16.mxu0 %v5201_v63  ;;  %v5258_v63 = vld [vmem:[#allocation5 + $0x194] ss:$28 sps:$4 sm:$0xff]   ;;  %v5310_v56 = vld [vmem:[#allocation5 + $0x388] ss:$28 sps:$4 sm:$0xff]  }
  0x97   :  { %3124 = vmatpush1.bf16.msra.mxu1 %v5203_v0  ;;  %v6073_v0 = vld [vmem:[#allocation2 + $0x10] sm:$0xff] }
  0x98   :  { %3189 = vmatpush1.bf16.msra.mxu0 %v5204_v1  ;;  %3125 = vmatprep.subr.bf16.mxu1 %v5205_v2  ;;  %v6077_v1 = vld [vmem:[#allocation2 + $0x30] sm:$0xff]  ;;  %v5253_v2 = vld [vmem:[#allocation5 + $0x888] ss:$28 sps:$4 sm:$0xff]  }
  0x99   :  { %3190 = vmatprep.subr.bf16.mxu0 %v5207_v3  ;;  %v5256_v3 = vld [vmem:[#allocation5 + $0x190] ss:$28 sps:$4 sm:$0xff]   ;;  %v6087_v50 = vcombine.low %v6073_v0, %v6077_v1 }
  0x9b   :  { %3126 = vmatpush1.bf16.msra.mxu1 %v5209_v4  ;;  %v6081_v4 = vcombine.high %v6073_v0, %v6077_v1  ;;  %v5321_v0 = vld [vmem:[#allocation5 + $0xaf4] ss:$28 sps:$4 sm:$0xff]   ;;  %v5324_v1 = vld [vmem:[#allocation5 + $0x3fc] ss:$28 sps:$4 sm:$0xff]  }
  0x9c   :  { %3191 = vmatpush1.bf16.msra.mxu0 %v5210_v5  ;;  %3355 = vmatprep.subr.bf16.mxu1 %v5216_v7  ;;  %v5261_v5 = vld [vmem:[#allocation5 + $0x8c4] ss:$28 sps:$4 sm:$0xff]  }
  0x9d   :  { %3225 = vmatprep.subr.bf16.mxu0 %v5213_v6  ;;  %v5264_v6 = vld [vmem:[#allocation5 + $0x1cc] ss:$28 sps:$4 sm:$0xff]   ;;  %v5259_v7 = vld [vmem:[#allocation5 + $0x8c0] ss:$28 sps:$4 sm:$0xff]  }
  0x9e   :  { %3128 = vmatmul.mubr.bf16.vlgmr.msra.gmra.mrb[0].mxu1 %v6033_v8 }
  0x9f   :  { %3193 = vmatmul.mubr.bf16.vlgmr.msra.gmra.mrb[0].mxu0 %v6035_v11  ;;  %3356 = vmatpush1.bf16.msra.mxu1 %v5214_v10  ;;  %v5267_v10 = vld [vmem:[#allocation5 + $0x8fc] ss:$28 sps:$4 sm:$0xff]  }
  0xa0   :  { %3226 = vmatpush1.bf16.msra.mxu0 %v5211_v9  ;;  %3357 = vmatprep.subr.bf16.mxu1 %v5222_v13  ;;  %v5262_v9 = vld [vmem:[#allocation5 + $0x1c8] ss:$28 sps:$4 sm:$0xff]   ;;  %v5265_v13 = vld [vmem:[#allocation5 + $0x8f8] ss:$28 sps:$4 sm:$0xff]  }
  0xa1   :  { %3227 = vmatprep.subr.bf16.mxu0 %v5219_v12  ;;  %3137 = vmatprep.mubr.bf16.mxu1 %v6039_v25  ;;  %v5270_v12 = vld [vmem:[#allocation5 + $0x204] ss:$28 sps:$4 sm:$0xff]  }
  0xa2   :  { %3202 = vmatprep.mubr.bf16.mxu0 %v6043_v27 }
  0xa3   :  { %3358 = vmatpush1.bf16.msra.mxu1 %v5220_v15  ;;  %v5273_v15 = vld [vmem:[#allocation5 + $0x934] ss:$28 sps:$4 sm:$0xff]  }
  0xa4   :  { %3228 = vmatpush1.bf16.msra.mxu0 %v5217_v14  ;;  %3359 = vmatprep.subr.bf16.mxu1 %v5228_v17  ;;  %v5268_v14 = vld [vmem:[#allocation5 + $0x200] ss:$28 sps:$4 sm:$0xff]   ;;  %v5271_v17 = vld [vmem:[#allocation5 + $0x930] ss:$28 sps:$4 sm:$0xff]  }
  0xa5   :  { %3229 = vmatprep.subr.bf16.mxu0 %v5225_v16  ;;  %v5276_v16 = vld [vmem:[#allocation5 + $0x23c] ss:$28 sps:$4 sm:$0xff]  }
  0xa6   :  { %3138 = vmatmul.mubr.bf16.gmra.mrb[4].mxu1 %v6041_v26 }
  0xa7   :  { %3203 = vmatmul.mubr.bf16.gmra.mrb[4].mxu0 %v6045_v29  ;;  %3360 = vmatpush1.bf16.msra.mxu1 %v5226_v19  ;;  %v5279_v19 = vld [vmem:[#allocation5 + $0x96c] ss:$28 sps:$4 sm:$0xff]  }
  0xa8   :  { %3230 = vmatpush1.bf16.msra.mxu0 %v5223_v18  ;;  %3361 = vmatprep.subr.bf16.mxu1 %v5234_v28  ;;  %v5274_v18 = vld [vmem:[#allocation5 + $0x238] ss:$28 sps:$4 sm:$0xff]   ;;  %v5283_v28 = vld [vmem:[#allocation5 + $0x9a0] ss:$28 sps:$4 sm:$0xff]  }
  0xa9   :  { %3231 = vmatprep.subr.bf16.mxu0 %v5231_v24  ;;  %3143 = vmatprep.mubr.bf16.mxu1 %v6051_v36  ;;  %v5288_v24 = vld [vmem:[#allocation5 + $0x2ac] ss:$28 sps:$4 sm:$0xff]  }
  0xaa   :  { %3208 = vmatprep.mubr.bf16.mxu0 %v6055_v42 }
  0xab   :  { %3362 = vmatpush1.bf16.msra.mxu1 %v5232_v31  ;;  %v5291_v31 = vld [vmem:[#allocation5 + $0x9dc] ss:$28 sps:$4 sm:$0xff]  }
  0xac   :  { %3232 = vmatpush1.bf16.msra.mxu0 %v5229_v30  ;;  %3363 = vmatprep.subr.bf16.mxu1 %v5240_v33  ;;  %v5286_v30 = vld [vmem:[#allocation5 + $0x2a8] ss:$28 sps:$4 sm:$0xff]   ;;  %v5289_v33 = vld [vmem:[#allocation5 + $0x9d8] ss:$28 sps:$4 sm:$0xff]  }
  0xad   :  { %3233 = vmatprep.subr.bf16.mxu0 %v5237_v32  ;;  %v5294_v32 = vld [vmem:[#allocation5 + $0x2e4] ss:$28 sps:$4 sm:$0xff]  }
  0xae   :  { %3144 = vmatmul.mubr.bf16.gmra.mrb[8].mxu1 %v6053_v41 }
  0xaf   :  { %3209 = vmatmul.mubr.bf16.gmra.mrb[8].mxu0 %v6057_v43  ;;  %3364 = vmatpush1.bf16.msra.mxu1 %v5238_v40  ;;  %v5303_v40 = vld [vmem:[#allocation5 + $0xa4c] ss:$28 sps:$4 sm:$0xff]  }
  0xb0   :  { %3234 = vmatpush1.bf16.msra.mxu0 %v5235_v39  ;;  %3365 = vmatprep.subr.bf16.mxu1 %v5246_v45  ;;  %v5298_v39 = vld [vmem:[#allocation5 + $0x318] ss:$28 sps:$4 sm:$0xff]   ;;  %v5301_v45 = vld [vmem:[#allocation5 + $0xa48] ss:$28 sps:$4 sm:$0xff]  }
  0xb1   :  { %3235 = vmatprep.subr.bf16.mxu0 %v5243_v44  ;;  %3153 = vmatprep.mubr.bf16.mxu1 %v6063_v55  ;;  %v5306_v44 = vld [vmem:[#allocation5 + $0x354] ss:$28 sps:$4 sm:$0xff]  }
  0xb2   :  { %3218 = vmatprep.mubr.bf16.mxu0 %v6065_v57 }
  0xb3   :  { %3366 = vmatpush1.bf16.msra.mxu1 %v5244_v47  ;;  %v5309_v47 = vld [vmem:[#allocation5 + $0xa84] ss:$28 sps:$4 sm:$0xff]  }
  0xb4   :  { %3236 = vmatpush1.bf16.msra.mxu0 %v5241_v46  ;;  %3367 = vmatprep.subr.bf16.mxu1 %v5252_v49  ;;  %v5304_v46 = vld [vmem:[#allocation5 + $0x350] ss:$28 sps:$4 sm:$0xff]  }
  0xb5   :  { %3237 = vmatprep.subr.bf16.mxu0 %v5249_v48  ;;  %v5312_v48 = vld [vmem:[#allocation5 + $0x38c] ss:$28 sps:$4 sm:$0xff]   ;;  %v97_v49 = vld [vmem:[#allocation2 + $0x50] sm:$0xff] }
  0xb6   :  { %3154 = vmatmul.mubr.bf16.gmra.mrb[12].mxu1 %v6068_v60 }
  0xb7   :  { %3219 = vmatmul.mubr.bf16.gmra.mrb[12].mxu0 %v6070_v61  ;;  %3368 = vmatpush1.bf16.msra.mxu1 %v5250_v59  ;;  %v5318_v59 = vld [vmem:[#allocation5 + $0x3c4] ss:$28 sps:$4 sm:$0xff]  }
  0xb8   :  { %3238 = vmatpush1.bf16.msra.mxu0 %v5247_v58  ;;  %3369 = vmatprep.subr.bf16.mxu1 %v5258_v63  ;;  %v5315_v58 = vld [vmem:[#allocation5 + $0xabc] ss:$28 sps:$4 sm:$0xff]  }
  0xb9   :  { %3239 = vmatprep.subr.bf16.mxu0 %v5255_v62  ;;  %3257 = vmatprep.mubr.bf16.mxu0 %v6081_v4  ;;  %v6089_v62 = vcombine.high %v97_v49, %v101_v51  ;;  %v5313_v63 = vld [vmem:[#allocation5 + $0xab8] ss:$28 sps:$4 sm:$0xff]  }
  0xba   :  { %3387 = vmatprep.mubr.bf16.mxu1 %v6027_v53 }
  0xbb   :  { %3370 = vmatpush1.bf16.msra.mxu1 %v5256_v3  ;;  %v6095_v3 = vcombine.low %v97_v49, %v101_v51  ;;  %v5360_v49 = vld [vmem:[#allocation5 + $0x54c] ss:$28 sps:$4 sm:$0xff]   ;;  %v5355_v51 = vld [vmem:[#allocation5 + $0xc40] ss:$28 sps:$4 sm:$0xff]  }
  0xbc   :  { %3240 = vmatpush1.bf16.msra.mxu0 %v5253_v2  ;;  %3371 = vmatprep.subr.bf16.mxu1 %v5264_v6  ;;  %v5316_v2 = vld [vmem:[#allocation5 + $0x3c0] ss:$28 sps:$4 sm:$0xff]   ;;  %v109_v6 = vld [vmem:[#allocation2 + $0xb0] sm:$0xff] }
  0xbd   :  { %3241 = vmatprep.subr.bf16.mxu0 %v5261_v5  ;;  %v105_v5 = vld [vmem:[#allocation2 + $0x90] sm:$0xff] }
  0xbf   :  { %3372 = vmatpush1.bf16.msra.mxu1 %v5262_v9  ;;  %v5322_v9 = vld [vmem:[#allocation5 + $0x3f8] ss:$28 sps:$4 sm:$0xff]  }
  0xc0   :  { %3242 = vmatpush1.bf16.msra.mxu0 %v5259_v7  ;;  %3373 = vmatprep.subr.bf16.mxu1 %v5270_v12  ;;  %v5319_v7 = vld [vmem:[#allocation5 + $0xaf0] ss:$28 sps:$4 sm:$0xff]  }
  0xc1   :  { %3243 = vmatprep.subr.bf16.mxu0 %v5267_v10  ;;  %v5327_v10 = vld [vmem:[#allocation5 + $0xb2c] ss:$28 sps:$4 sm:$0xff]   ;;  %v5330_v12 = vld [vmem:[#allocation5 + $0x434] ss:$28 sps:$4 sm:$0xff]  }
  0xc3   :  { %3374 = vmatpush1.bf16.msra.mxu1 %v5268_v14  ;;  %v5325_v14 = vld [vmem:[#allocation5 + $0xb28] ss:$28 sps:$4 sm:$0xff]  }
  0xc4   :  { %3244 = vmatpush1.bf16.msra.mxu0 %v5265_v13  ;;  %3375 = vmatprep.subr.bf16.mxu1 %v5276_v16  ;;  %v6097_v13 = vcombine.high %v105_v5, %v109_v6  ;;  %v5333_v16 = vld [vmem:[#allocation5 + $0xb64] ss:$28 sps:$4 sm:$0xff]  }
  0xc5   :  { %3245 = vmatprep.subr.bf16.mxu0 %v5273_v15  ;;  %v5328_v15 = vld [vmem:[#allocation5 + $0x430] ss:$28 sps:$4 sm:$0xff]  }
  0xc7   :  { %3376 = vmatpush1.bf16.msra.mxu1 %v5274_v18  ;;  %v5331_v18 = vld [vmem:[#allocation5 + $0xb60] ss:$28 sps:$4 sm:$0xff]  }
  0xc8   :  { %3246 = vmatpush1.bf16.msra.mxu0 %v5271_v17  ;;  %3377 = vmatprep.subr.bf16.mxu1 %v5282_v20  ;;  %v5336_v17 = vld [vmem:[#allocation5 + $0x46c] ss:$28 sps:$4 sm:$0xff]   ;;  %v6103_v20 = vcombine.low %v105_v5, %v109_v6  ;;  %v5370_v5 = vld [vmem:[#allocation5 + $0x5b8] ss:$28 sps:$4 sm:$0xff]  }
  0xc9   :  { %3247 = vmatprep.subr.bf16.mxu0 %v5279_v19  ;;  %v5334_v19 = vld [vmem:[#allocation5 + $0x468] ss:$28 sps:$4 sm:$0xff]  }
  0xca   :  { %v5375_v6 = vld [vmem:[#allocation5 + $0xcec] ss:$28 sps:$4 sm:$0xff]  }
  0xcb   :  { %3378 = vmatpush1.bf16.msra.mxu1 %v5280_v22  ;;  %v117_v22 = vld [vmem:[#allocation2 + $0xf0] sm:$0xff] }
  0xcc   :  { %3248 = vmatpush1.bf16.msra.mxu0 %v5277_v21  ;;  %3379 = vmatprep.subr.bf16.mxu1 %v5288_v24  ;;  %v113_v21 = vld [vmem:[#allocation2 + $0xd0] sm:$0xff]  ;;  %v5342_v24 = vld [vmem:[#allocation5 + $0x4a4] ss:$28 sps:$4 sm:$0xff]  }
  0xcd   :  { %3249 = vmatprep.subr.bf16.mxu0 %v5285_v23  ;;  %v5339_v23 = vld [vmem:[#allocation5 + $0xb9c] ss:$28 sps:$4 sm:$0xff]  }
  0xcf   :  { %3380 = vmatpush1.bf16.msra.mxu1 %v5286_v30  ;;  %v5337_v30 = vld [vmem:[#allocation5 + $0xb98] ss:$28 sps:$4 sm:$0xff]  }
  0xd0   :  { %3250 = vmatpush1.bf16.msra.mxu0 %v5283_v28  ;;  %3381 = vmatprep.subr.bf16.mxu1 %v5294_v32  ;;  %v6105_v28 = vcombine.high %v113_v21, %v117_v22  ;;  %v5345_v32 = vld [vmem:[#allocation5 + $0xbd4] ss:$28 sps:$4 sm:$0xff]  }
  0xd1   :  { %3251 = vmatprep.subr.bf16.mxu0 %v5291_v31  ;;  %v5340_v31 = vld [vmem:[#allocation5 + $0x4a0] ss:$28 sps:$4 sm:$0xff]  }
  0xd3   :  { %3382 = vmatpush1.bf16.msra.mxu1 %v5292_v34  ;;  %v6111_v34 = vld [vmem:[#allocation2 + $0x18] sm:$0xff] }
  0xd4   :  { %3252 = vmatpush1.bf16.msra.mxu0 %v5289_v33  ;;  %3383 = vmatprep.subr.bf16.mxu1 %v5300_v37  ;;  %v5348_v33 = vld [vmem:[#allocation5 + $0x4dc] ss:$28 sps:$4 sm:$0xff]  }
  0xd5   :  { %3253 = vmatprep.subr.bf16.mxu0 %v5297_v35  ;;  %v6113_v35 = vcombine.low %v113_v21, %v117_v22  ;;  %v6115_v37 = vld [vmem:[#allocation2 + $0x38] sm:$0xff]  ;;  %v5393_v22 = vld [vmem:[#allocation5 + $0xd94] ss:$28 sps:$4 sm:$0xff]  }
  0xd6   :  { %v5388_v21 = vld [vmem:[#allocation5 + $0x660] ss:$28 sps:$4 sm:$0xff]  }
  0xd7   :  { %3384 = vmatpush1.bf16.msra.mxu1 %v5298_v39  ;;  %v5346_v39 = vld [vmem:[#allocation5 + $0x4d8] ss:$28 sps:$4 sm:$0xff]  }
  0xd8   :  { %3254 = vmatpush1.bf16.msra.mxu0 %v5295_v38  ;;  %3385 = vmatprep.subr.bf16.mxu1 %v5306_v44  ;;  %v5343_v38 = vld [vmem:[#allocation5 + $0xbd0] ss:$28 sps:$4 sm:$0xff]  }
  0xd9   :  { %3255 = vmatprep.subr.bf16.mxu0 %v5303_v40  ;;  %v5351_v40 = vld [vmem:[#allocation5 + $0xc0c] ss:$28 sps:$4 sm:$0xff]   ;;  %v5354_v44 = vld [vmem:[#allocation5 + $0x514] ss:$28 sps:$4 sm:$0xff]  }
  0xdb   :  { %3386 = vmatpush1.bf16.msra.mxu1 %v5304_v46  ;;  %v5349_v46 = vld [vmem:[#allocation5 + $0xc08] ss:$28 sps:$4 sm:$0xff]  }
  0xdc   :  { %3256 = vmatpush1.bf16.msra.mxu0 %v5301_v45  ;;  %3420 = vmatprep.subr.bf16.mxu1 %v5312_v48  ;;  %v6119_v45 = vcombine.high %v6111_v34, %v6115_v37  ;;  %v5357_v48 = vld [vmem:[#allocation5 + $0xc44] ss:$28 sps:$4 sm:$0xff]  }
  0xdd   :  { %3290 = vmatprep.subr.bf16.mxu0 %v5309_v47  ;;  %v5352_v47 = vld [vmem:[#allocation5 + $0x510] ss:$28 sps:$4 sm:$0xff]  }
  0xde   :  { %3388 = vmatmul.mubr.bf16.vlgmr.msra.gmra.mrb[16].mxu1 %v6033_v8 }
  0xdf   :  { %3258 = vmatmul.mubr.bf16.vlgmr.msra.gmra.mrb[0].mxu0 %v6087_v50  ;;  %3421 = vmatpush1.bf16.msra.mxu1 %v5310_v56  ;;  %v5363_v56 = vld [vmem:[#allocation5 + $0xc7c] ss:$28 sps:$4 sm:$0xff]  }
  0xe0   :  { %3291 = vmatpush1.bf16.msra.mxu0 %v5307_v52  ;;  %3422 = vmatprep.subr.bf16.mxu1 %v5318_v59  ;;  %v5358_v52 = vld [vmem:[#allocation5 + $0x548] ss:$28 sps:$4 sm:$0xff]   ;;  %v5361_v59 = vld [vmem:[#allocation5 + $0xc78] ss:$28 sps:$4 sm:$0xff]  }
  0xe1   :  { %3292 = vmatprep.subr.bf16.mxu0 %v5315_v58  ;;  %3267 = vmatprep.mubr.bf16.mxu0 %v6089_v62  ;;  %v5366_v58 = vld [vmem:[#allocation5 + $0x584] ss:$28 sps:$4 sm:$0xff]  }
  0xe2   :  { %3395 = vmatprep.mubr.bf16.mxu1 %v6039_v25 }
  0xe3   :  { %3423 = vmatpush1.bf16.msra.mxu1 %v5316_v2  ;;  %v5369_v2 = vld [vmem:[#allocation5 + $0xcb4] ss:$28 sps:$4 sm:$0xff]  }
  0xe4   :  { %3293 = vmatpush1.bf16.msra.mxu0 %v5313_v63  ;;  %3424 = vmatprep.subr.bf16.mxu1 %v5324_v1  ;;  %v5364_v63 = vld [vmem:[#allocation5 + $0x580] ss:$28 sps:$4 sm:$0xff]   ;;  %v5367_v1 = vld [vmem:[#allocation5 + $0xcb0] ss:$28 sps:$4 sm:$0xff]  }
  0xe5   :  { %3294 = vmatprep.subr.bf16.mxu0 %v5321_v0  ;;  %v5372_v0 = vld [vmem:[#allocation5 + $0x5bc] ss:$28 sps:$4 sm:$0xff]  }
  0xe6   :  { %3396 = vmatmul.mubr.bf16.gmra.mrb[20].mxu1 %v6041_v26 }
  0xe7   :  { %3268 = vmatmul.mubr.bf16.gmra.mrb[16].mxu0 %v6095_v3  ;;  %3425 = vmatpush1.bf16.msra.mxu1 %v5322_v9  ;;  %v5373_v9 = vld [vmem:[#allocation5 + $0xce8] ss:$28 sps:$4 sm:$0xff]  }
  0xe8   :  { %3295 = vmatpush1.bf16.msra.mxu0 %v5319_v7  ;;  %3426 = vmatprep.subr.bf16.mxu1 %v5330_v12  ;;  %v5378_v7 = vld [vmem:[#allocation5 + $0x5f4] ss:$28 sps:$4 sm:$0xff]   ;;  %v5381_v12 = vld [vmem:[#allocation5 + $0xd24] ss:$28 sps:$4 sm:$0xff]  }
  0xe9   :  { %3296 = vmatprep.subr.bf16.mxu0 %v5327_v10  ;;  %3273 = vmatprep.mubr.bf16.mxu0 %v6097_v13  ;;  %v5376_v10 = vld [vmem:[#allocation5 + $0x5f0] ss:$28 sps:$4 sm:$0xff]  }
  0xea   :  { %3403 = vmatprep.mubr.bf16.mxu1 %v6051_v36 }
  0xeb   :  { %3427 = vmatpush1.bf16.msra.mxu1 %v5328_v15  ;;  %v5379_v15 = vld [vmem:[#allocation5 + $0xd20] ss:$28 sps:$4 sm:$0xff]  }
  0xec   :  { %3297 = vmatpush1.bf16.msra.mxu0 %v5325_v14  ;;  %3428 = vmatprep.subr.bf16.mxu1 %v5336_v17  ;;  %v5384_v14 = vld [vmem:[#allocation5 + $0x62c] ss:$28 sps:$4 sm:$0xff]   ;;  %v5387_v17 = vld [vmem:[#allocation5 + $0xd5c] ss:$28 sps:$4 sm:$0xff]  }
  0xed   :  { %3298 = vmatprep.subr.bf16.mxu0 %v5333_v16  ;;  %v5382_v16 = vld [vmem:[#allocation5 + $0x628] ss:$28 sps:$4 sm:$0xff]  }
  0xee   :  { %3404 = vmatmul.mubr.bf16.gmra.mrb[24].mxu1 %v6053_v41 }
  0xef   :  { %3274 = vmatmul.mubr.bf16.gmra.mrb[8].mxu0 %v6103_v20  ;;  %3429 = vmatpush1.bf16.msra.mxu1 %v5334_v19  ;;  %v5385_v19 = vld [vmem:[#allocation5 + $0xd58] ss:$28 sps:$4 sm:$0xff]  }
  0xf0   :  { %3299 = vmatpush1.bf16.msra.mxu0 %v5331_v18  ;;  %3430 = vmatprep.subr.bf16.mxu1 %v5342_v24  ;;  %v5390_v18 = vld [vmem:[#allocation5 + $0x664] ss:$28 sps:$4 sm:$0xff]   ;;  %v5391_v24 = vld [vmem:[#allocation5 + $0xd90] ss:$28 sps:$4 sm:$0xff]  }
  0xf1   :  { %3300 = vmatprep.subr.bf16.mxu0 %v5339_v23  ;;  %3283 = vmatprep.mubr.bf16.mxu0 %v6105_v28  ;;  %v5396_v23 = vld [vmem:[#allocation5 + $0x69c] ss:$28 sps:$4 sm:$0xff]  }
  0xf2   :  { %3411 = vmatprep.mubr.bf16.mxu1 %v6063_v55 }
  0xf3   :  { %3431 = vmatpush1.bf16.msra.mxu1 %v5340_v31  ;;  %v5399_v31 = vld [vmem:[#allocation5 + $0xdcc] ss:$28 sps:$4 sm:$0xff]  }
  0xf4   :  { %3301 = vmatpush1.bf16.msra.mxu0 %v5337_v30  ;;  %3432 = vmatprep.subr.bf16.mxu1 %v5348_v33  ;;  %v5394_v30 = vld [vmem:[#allocation5 + $0x698] ss:$28 sps:$4 sm:$0xff]   ;;  %v5397_v33 = vld [vmem:[#allocation5 + $0xdc8] ss:$28 sps:$4 sm:$0xff]  }
  0xf5   :  { %3302 = vmatprep.subr.bf16.mxu0 %v5345_v32  ;;  %v5402_v32 = vld [vmem:[#allocation5 + $0x6d4] ss:$28 sps:$4 sm:$0xff]  }
  0xf6   :  { %3412 = vmatmul.mubr.bf16.gmra.mrb[28].mxu1 %v6068_v60 }
  0xf7   :  { %3284 = vmatmul.mubr.bf16.gmra.mrb[20].mxu0 %v6113_v35  ;;  %3433 = vmatpush1.bf16.msra.mxu1 %v5346_v39  ;;  %v5405_v39 = vld [vmem:[#allocation5 + $0x70c] ss:$28 sps:$4 sm:$0xff]  }
  0xf8   :  { %3303 = vmatpush1.bf16.msra.mxu0 %v5343_v38  ;;  %3434 = vmatprep.subr.bf16.mxu1 %v5354_v44  ;;  %v5400_v38 = vld [vmem:[#allocation5 + $0x6d0] ss:$28 sps:$4 sm:$0xff]   ;;  %v5403_v44 = vld [vmem:[#allocation5 + $0x708] ss:$28 sps:$4 sm:$0xff]  }
  0xf9   :  { %3304 = vmatprep.subr.bf16.mxu0 %v5351_v40  ;;  %3322 = vmatprep.mubr.bf16.mxu0 %v6119_v45  ;;  %v5408_v40 = vld [vmem:[#allocation5 + $0x14] ss:$28 sps:$4 sm:$0xff]  }
  0xfa   :  { %3452 = vmatprep.mubr.bf16.mxu1 %v6029_v54 }
  0xfb   :  { %3435 = vmatpush1.bf16.msra.mxu1 %v5352_v47  ;;  %v6127_v47 = vcombine.low %v6111_v34, %v6115_v37  ;;  %v5417_v34 = vld [vmem:[#allocation5 + $0x77c] ss:$28 sps:$4 sm:$0xff]   ;;  %v5420_v37 = vld [vmem:[#allocation5 + $0x84] ss:$28 sps:$4 sm:$0xff]  }
  0xfc   :  { %3305 = vmatpush1.bf16.msra.mxu0 %v5349_v46  ;;  %3436 = vmatprep.subr.bf16.mxu1 %v5360_v49  ;;  %v5406_v46 = vld [vmem:[#allocation5 + $0x10] ss:$28 sps:$4 sm:$0xff]   ;;  %v102_v49 = vld [vmem:[#allocation2 + $0x78] sm:$0xff] }
  0xfd   :  { %3306 = vmatprep.subr.bf16.mxu0 %v5357_v48  ;;  %v98_v48 = vld [vmem:[#allocation2 + $0x58] sm:$0xff] }
  0xff   :  { %3437 = vmatpush1.bf16.msra.mxu1 %v5358_v52  ;;  %v5414_v52 = vld [vmem:[#allocation5 + $0x4c] ss:$28 sps:$4 sm:$0xff]  }
 0x100   :  { %3307 = vmatpush1.bf16.msra.mxu0 %v5355_v51  ;;  %3438 = vmatprep.subr.bf16.mxu1 %v5366_v58  ;;  %v5411_v51 = vld [vmem:[#allocation5 + $0x744] ss:$28 sps:$4 sm:$0xff]  }
 0x101   :  { %3308 = vmatprep.subr.bf16.mxu0 %v5363_v56  ;;  %v6129_v56 = vcombine.high %v98_v48, %v102_v49  ;;  %v5409_v58 = vld [vmem:[#allocation5 + $0x740] ss:$28 sps:$4 sm:$0xff]  }
 0x103   :  { %3439 = vmatpush1.bf16.msra.mxu1 %v5364_v63  ;;  %v5415_v63 = vld [vmem:[#allocation5 + $0x778] ss:$28 sps:$4 sm:$0xff]  }
 0x104   :  { %3309 = vmatpush1.bf16.msra.mxu0 %v5361_v59  ;;  %3440 = vmatprep.subr.bf16.mxu1 %v5372_v0  ;;  %v5412_v59 = vld [vmem:[#allocation5 + $0x48] ss:$28 sps:$4 sm:$0xff]   ;;  %v6135_v0 = vcombine.low %v98_v48, %v102_v49  ;;  %v5445_v48 = vld [vmem:[#allocation5 + $0x890] ss:$28 sps:$4 sm:$0xff]   ;;  %v5448_v49 = vld [vmem:[#allocation5 + $0x198] ss:$28 sps:$4 sm:$0xff]  }
 0x105   :  { %3310 = vmatprep.subr.bf16.mxu0 %v5369_v2  ;;  %v5418_v2 = vld [vmem:[#allocation5 + $0x80] ss:$28 sps:$4 sm:$0xff]  }
 0x107   :  { %3441 = vmatpush1.bf16.msra.mxu1 %v5370_v5  ;;  %v110_v5 = vld [vmem:[#allocation2 + $0xb8] sm:$0xff] }
 0x108   :  { %3311 = vmatpush1.bf16.msra.mxu0 %v5367_v1  ;;  %3442 = vmatprep.subr.bf16.mxu1 %v5378_v7  ;;  %v106_v1 = vld [vmem:[#allocation2 + $0x98] sm:$0xff] }
 0x109   :  { %3312 = vmatprep.subr.bf16.mxu0 %v5375_v6  ;;  %v5423_v6 = vld [vmem:[#allocation5 + $0x7b4] ss:$28 sps:$4 sm:$0xff]   ;;  %v5426_v7 = vld [vmem:[#allocation5 + $0xbc] ss:$28 sps:$4 sm:$0xff]  }
 0x10b   :  { %3443 = vmatpush1.bf16.msra.mxu1 %v5376_v10  ;;  %v5421_v10 = vld [vmem:[#allocation5 + $0x7b0] ss:$28 sps:$4 sm:$0xff]  }
 0x10c   :  { %3313 = vmatpush1.bf16.msra.mxu0 %v5373_v9  ;;  %3444 = vmatprep.subr.bf16.mxu1 %v5384_v14  ;;  %v6137_v9 = vcombine.high %v106_v1, %v110_v5  ;;  %v5429_v14 = vld [vmem:[#allocation5 + $0x7ec] ss:$28 sps:$4 sm:$0xff]  }
 0x10d   :  { %3314 = vmatprep.subr.bf16.mxu0 %v5381_v12  ;;  %v5424_v12 = vld [vmem:[#allocation5 + $0xb8] ss:$28 sps:$4 sm:$0xff]  }
 0x10f   :  { %3445 = vmatpush1.bf16.msra.mxu1 %v5382_v16  ;;  %v5427_v16 = vld [vmem:[#allocation5 + $0x7e8] ss:$28 sps:$4 sm:$0xff]  }
 0x110   :  { %3315 = vmatpush1.bf16.msra.mxu0 %v5379_v15  ;;  %3446 = vmatprep.subr.bf16.mxu1 %v5390_v18  ;;  %v5432_v15 = vld [vmem:[#allocation5 + $0xf4] ss:$28 sps:$4 sm:$0xff]   ;;  %v6143_v18 = vcombine.low %v106_v1, %v110_v5  ;;  %v5465_v1 = vld [vmem:[#allocation5 + $0x93c] ss:$28 sps:$4 sm:$0xff]   ;;  %v5468_v5 = vld [vmem:[#allocation5 + $0x244] ss:$28 sps:$4 sm:$0xff]  }
 0x111   :  { %3316 = vmatprep.subr.bf16.mxu0 %v5387_v17  ;;  %v5430_v17 = vld [vmem:[#allocation5 + $0xf0] ss:$28 sps:$4 sm:$0xff]  }
 0x113   :  { %3447 = vmatpush1.bf16.msra.mxu1 %v5388_v21  ;;  %v118_v21 = vld [vmem:[#allocation2 + $0xf8] sm:$0xff] }
 0x114   :  { %3317 = vmatpush1.bf16.msra.mxu0 %v5385_v19  ;;  %3448 = vmatprep.subr.bf16.mxu1 %v5396_v23  ;;  %v114_v19 = vld [vmem:[#allocation2 + $0xd8] sm:$0xff]  ;;  %v5438_v23 = vld [vmem:[#allocation5 + $0x12c] ss:$28 sps:$4 sm:$0xff]  }
 0x115   :  { %3318 = vmatprep.subr.bf16.mxu0 %v5393_v22  ;;  %v5435_v22 = vld [vmem:[#allocation5 + $0x824] ss:$28 sps:$4 sm:$0xff]  }
 0x117   :  { %3449 = vmatpush1.bf16.msra.mxu1 %v5394_v30  ;;  %v5433_v30 = vld [vmem:[#allocation5 + $0x820] ss:$28 sps:$4 sm:$0xff]  }
 0x118   :  { %3319 = vmatpush1.bf16.msra.mxu0 %v5391_v24  ;;  %3450 = vmatprep.subr.bf16.mxu1 %v5402_v32  ;;  %v6145_v24 = vcombine.high %v114_v19, %v118_v21  ;;  %v5441_v32 = vld [vmem:[#allocation5 + $0x85c] ss:$28 sps:$4 sm:$0xff]  }
 0x119   :  { %3320 = vmatprep.subr.bf16.mxu0 %v5399_v31  ;;  %v5436_v31 = vld [vmem:[#allocation5 + $0x128] ss:$28 sps:$4 sm:$0xff]  }
 0x11b   :  { %3451 = vmatpush1.bf16.msra.mxu1 %v5400_v38  ;;  %v5439_v38 = vld [vmem:[#allocation5 + $0x858] ss:$28 sps:$4 sm:$0xff]  }
 0x11c   :  { %3321 = vmatpush1.bf16.msra.mxu0 %v5397_v33  ;;  %3485 = vmatprep.subr.bf16.mxu1 %v5405_v39  ;;  %v5444_v33 = vld [vmem:[#allocation5 + $0x164] ss:$28 sps:$4 sm:$0xff]  }
 0x11d   :  { %3615 = vmatprep.subr.bf16.mxu0 %v5408_v40  ;;  %v5442_v39 = vld [vmem:[#allocation5 + $0x160] ss:$28 sps:$4 sm:$0xff]   ;;  %v6151_v40 = vcombine.low %v114_v19, %v118_v21  ;;  %v5475_v19 = vld [vmem:[#allocation5 + $0x9a8] ss:$28 sps:$4 sm:$0xff]   ;;  %v5478_v21 = vld [vmem:[#allocation5 + $0x2b0] ss:$28 sps:$4 sm:$0xff]  }
 0x11e   :  { %3453 = vmatmul.mubr.bf16.vlgmr.msra.gmra.mrb[16].mxu1 %v6035_v11 }
 0x11f   :  { %3323 = vmatmul.mubr.bf16.vlgmr.msra.gmra.mrb[0].mxu0 %v6127_v47  ;;  %3486 = vmatpush1.bf16.msra.mxu1 %v5403_v44  ;;  %v5447_v44 = vld [vmem:[#allocation5 + $0x894] ss:$28 sps:$4 sm:$0xff]  }
 0x120   :  { %3616 = vmatpush1.bf16.msra.mxu0 %v5406_v46  ;;  %3487 = vmatprep.subr.bf16.mxu1 %v5411_v51  ;;  %v5450_v46 = vld [vmem:[#allocation5 + $0x19c] ss:$28 sps:$4 sm:$0xff]   ;;  %v5453_v51 = vld [vmem:[#allocation5 + $0x8cc] ss:$28 sps:$4 sm:$0xff]  }
 0x121   :  { %3617 = vmatprep.subr.bf16.mxu0 %v5414_v52  ;;  %3332 = vmatprep.mubr.bf16.mxu0 %v6129_v56  ;;  %v5456_v52 = vld [vmem:[#allocation5 + $0x1d4] ss:$28 sps:$4 sm:$0xff]  }
 0x122   :  { %3460 = vmatprep.mubr.bf16.mxu1 %v6043_v27 }
 0x123   :  { %3488 = vmatpush1.bf16.msra.mxu1 %v5409_v58  ;;  %v5451_v58 = vld [vmem:[#allocation5 + $0x8c8] ss:$28 sps:$4 sm:$0xff]  }
 0x124   :  { %3618 = vmatpush1.bf16.msra.mxu0 %v5412_v59  ;;  %3489 = vmatprep.subr.bf16.mxu1 %v5417_v34  ;;  %v5454_v59 = vld [vmem:[#allocation5 + $0x1d0] ss:$28 sps:$4 sm:$0xff]   ;;  %v5459_v34 = vld [vmem:[#allocation5 + $0x904] ss:$28 sps:$4 sm:$0xff]  }
 0x125   :  { %3619 = vmatprep.subr.bf16.mxu0 %v5420_v37  ;;  %v5462_v37 = vld [vmem:[#allocation5 + $0x20c] ss:$28 sps:$4 sm:$0xff]  }
 0x126   :  { %3461 = vmatmul.mubr.bf16.gmra.mrb[20].mxu1 %v6045_v29 }
 0x127   :  { %3333 = vmatmul.mubr.bf16.gmra.mrb[24].mxu0 %v6135_v0  ;;  %3490 = vmatpush1.bf16.msra.mxu1 %v5415_v63  ;;  %v5457_v63 = vld [vmem:[#allocation5 + $0x900] ss:$28 sps:$4 sm:$0xff]  }
 0x128   :  { %3620 = vmatpush1.bf16.msra.mxu0 %v5418_v2  ;;  %3491 = vmatprep.subr.bf16.mxu1 %v5423_v6  ;;  %v5460_v2 = vld [vmem:[#allocation5 + $0x208] ss:$28 sps:$4 sm:$0xff]   ;;  %v5463_v6 = vld [vmem:[#allocation5 + $0x938] ss:$28 sps:$4 sm:$0xff]  }
 0x129   :  { %3621 = vmatprep.subr.bf16.mxu0 %v5426_v7  ;;  %3338 = vmatprep.mubr.bf16.mxu0 %v6137_v9  ;;  %v5466_v7 = vld [vmem:[#allocation5 + $0x240] ss:$28 sps:$4 sm:$0xff]  }
 0x12a   :  { %3468 = vmatprep.mubr.bf16.mxu1 %v6055_v42 }
 0x12b   :  { %3492 = vmatpush1.bf16.msra.mxu1 %v5421_v10  ;;  %v5471_v10 = vld [vmem:[#allocation5 + $0x974] ss:$28 sps:$4 sm:$0xff]  }
 0x12c   :  { %3622 = vmatpush1.bf16.msra.mxu0 %v5424_v12  ;;  %3493 = vmatprep.subr.bf16.mxu1 %v5429_v14  ;;  %v5474_v12 = vld [vmem:[#allocation5 + $0x27c] ss:$28 sps:$4 sm:$0xff]   ;;  %v5469_v14 = vld [vmem:[#allocation5 + $0x970] ss:$28 sps:$4 sm:$0xff]  }
 0x12d   :  { %3623 = vmatprep.subr.bf16.mxu0 %v5432_v15  ;;  %v5472_v15 = vld [vmem:[#allocation5 + $0x278] ss:$28 sps:$4 sm:$0xff]  }
 0x12e   :  { %3469 = vmatmul.mubr.bf16.gmra.mrb[24].mxu1 %v6057_v43 }
 0x12f   :  { %3339 = vmatmul.mubr.bf16.gmra.mrb[8].mxu0 %v6143_v18  ;;  %3494 = vmatpush1.bf16.msra.mxu1 %v5427_v16  ;;  %v5477_v16 = vld [vmem:[#allocation5 + $0x9ac] ss:$28 sps:$4 sm:$0xff]  }
 0x130   :  { %3624 = vmatpush1.bf16.msra.mxu0 %v5430_v17  ;;  %3495 = vmatprep.subr.bf16.mxu1 %v5435_v22  ;;  %v5480_v17 = vld [vmem:[#allocation5 + $0x2b4] ss:$28 sps:$4 sm:$0xff]   ;;  %v5483_v22 = vld [vmem:[#allocation5 + $0x9e4] ss:$28 sps:$4 sm:$0xff]  }
 0x131   :  { %3625 = vmatprep.subr.bf16.mxu0 %v5438_v23  ;;  %3348 = vmatprep.mubr.bf16.mxu0 %v6145_v24  ;;  %v5486_v23 = vld [vmem:[#allocation5 + $0x2ec] ss:$28 sps:$4 sm:$0xff]  }
 0x132   :  { %3476 = vmatprep.mubr.bf16.mxu1 %v6065_v57 }
 0x133   :  { %3496 = vmatpush1.bf16.msra.mxu1 %v5433_v30  ;;  %v5481_v30 = vld [vmem:[#allocation5 + $0x9e0] ss:$28 sps:$4 sm:$0xff]  }
 0x134   :  { %3626 = vmatpush1.bf16.msra.mxu0 %v5436_v31  ;;  %3497 = vmatprep.subr.bf16.mxu1 %v5441_v32  ;;  %v5484_v31 = vld [vmem:[#allocation5 + $0x2e8] ss:$28 sps:$4 sm:$0xff]   ;;  %v5489_v32 = vld [vmem:[#allocation5 + $0xa1c] ss:$28 sps:$4 sm:$0xff]  }
 0x135   :  { %3627 = vmatprep.subr.bf16.mxu0 %v5444_v33  ;;  %v5492_v33 = vld [vmem:[#allocation5 + $0x324] ss:$28 sps:$4 sm:$0xff]  }
 0x136   :  { %3477 = vmatmul.mubr.bf16.gmra.mrb[28].mxu1 %v6070_v61 }
 0x137   :  { %3349 = vmatmul.mubr.bf16.gmra.mrb[28].mxu0 %v6151_v40  ;;  %3498 = vmatpush1.bf16.msra.mxu1 %v5439_v38  ;;  %v5487_v38 = vld [vmem:[#allocation5 + $0xa18] ss:$28 sps:$4 sm:$0xff]  }
 0x138   :  { %3628 = vmatpush1.bf16.msra.mxu0 %v5442_v39  ;;  %3499 = vmatprep.subr.bf16.mxu1 %v5447_v44  ;;  %v5490_v39 = vld [vmem:[#allocation5 + $0x320] ss:$28 sps:$4 sm:$0xff]   ;;  %v5495_v44 = vld [vmem:[#allocation5 + $0xa54] ss:$28 sps:$4 sm:$0xff]  }
 0x139   :  { %3629 = vmatprep.subr.bf16.mxu0 %v5450_v46  ;;  %3517 = vmatprep.mubr.bf16.mxu1 %v6081_v4  ;;  %v5498_v46 = vld [vmem:[#allocation5 + $0x35c] ss:$28 sps:$4 sm:$0xff]  }
 0x13a   :  { %3647 = vmatprep.mubr.bf16.mxu0 %v6027_v53 }
 0x13b   :  { %3500 = vmatpush1.bf16.msra.mxu1 %v5445_v48  ;;  %v5493_v48 = vld [vmem:[#allocation5 + $0xa50] ss:$28 sps:$4 sm:$0xff]  }
 0x13c   :  { %3630 = vmatpush1.bf16.msra.mxu0 %v5448_v49  ;;  %3501 = vmatprep.subr.bf16.mxu1 %v5453_v51  ;;  %v5496_v49 = vld [vmem:[#allocation5 + $0x358] ss:$28 sps:$4 sm:$0xff]   ;;  %v5501_v51 = vld [vmem:[#allocation5 + $0xa8c] ss:$28 sps:$4 sm:$0xff]  }
 0x13d   :  { %3631 = vmatprep.subr.bf16.mxu0 %v5456_v52  ;;  %v5504_v52 = vld [vmem:[#allocation5 + $0x394] ss:$28 sps:$4 sm:$0xff]  }
 0x13f   :  { %3502 = vmatpush1.bf16.msra.mxu1 %v5451_v58  ;;  %v5499_v58 = vld [vmem:[#allocation5 + $0xa88] ss:$28 sps:$4 sm:$0xff]  }
 0x140   :  { %3632 = vmatpush1.bf16.msra.mxu0 %v5454_v59  ;;  %3503 = vmatprep.subr.bf16.mxu1 %v5459_v34  ;;  %v5502_v59 = vld [vmem:[#allocation5 + $0x390] ss:$28 sps:$4 sm:$0xff]   ;;  %v5507_v34 = vld [vmem:[#allocation5 + $0xac4] ss:$28 sps:$4 sm:$0xff]  }
 0x141   :  { %3633 = vmatprep.subr.bf16.mxu0 %v5462_v37  ;;  %v5510_v37 = vld [vmem:[#allocation5 + $0x3cc] ss:$28 sps:$4 sm:$0xff]  }
 0x143   :  { %3504 = vmatpush1.bf16.msra.mxu1 %v5457_v63  ;;  %v5505_v63 = vld [vmem:[#allocation5 + $0xac0] ss:$28 sps:$4 sm:$0xff]  }
 0x144   :  { %3634 = vmatpush1.bf16.msra.mxu0 %v5460_v2  ;;  %3505 = vmatprep.subr.bf16.mxu1 %v5465_v1  ;;  %v5508_v2 = vld [vmem:[#allocation5 + $0x3c8] ss:$28 sps:$4 sm:$0xff]   ;;  %v5513_v1 = vld [vmem:[#allocation5 + $0xafc] ss:$28 sps:$4 sm:$0xff]  }
 0x145   :  { %3635 = vmatprep.subr.bf16.mxu0 %v5468_v5  ;;  %v5516_v5 = vld [vmem:[#allocation5 + $0x404] ss:$28 sps:$4 sm:$0xff]  }
 0x147   :  { %3506 = vmatpush1.bf16.msra.mxu1 %v5463_v6  ;;  %v5511_v6 = vld [vmem:[#allocation5 + $0xaf8] ss:$28 sps:$4 sm:$0xff]  }
 0x148   :  { %3636 = vmatpush1.bf16.msra.mxu0 %v5466_v7  ;;  %3507 = vmatprep.subr.bf16.mxu1 %v5471_v10  ;;  %v5514_v7 = vld [vmem:[#allocation5 + $0x400] ss:$28 sps:$4 sm:$0xff]   ;;  %v5519_v10 = vld [vmem:[#allocation5 + $0xb34] ss:$28 sps:$4 sm:$0xff]  }
 0x149   :  { %3637 = vmatprep.subr.bf16.mxu0 %v5474_v12  ;;  %v5522_v12 = vld [vmem:[#allocation5 + $0x43c] ss:$28 sps:$4 sm:$0xff]  }
 0x14b   :  { %3508 = vmatpush1.bf16.msra.mxu1 %v5469_v14  ;;  %v5517_v14 = vld [vmem:[#allocation5 + $0xb30] ss:$28 sps:$4 sm:$0xff]  }
 0x14c   :  { %3638 = vmatpush1.bf16.msra.mxu0 %v5472_v15  ;;  %3509 = vmatprep.subr.bf16.mxu1 %v5477_v16  ;;  %v5520_v15 = vld [vmem:[#allocation5 + $0x438] ss:$28 sps:$4 sm:$0xff]   ;;  %v5525_v16 = vld [vmem:[#allocation5 + $0xb6c] ss:$28 sps:$4 sm:$0xff]  }
 0x14d   :  { %3639 = vmatprep.subr.bf16.mxu0 %v5480_v17  ;;  %v5528_v17 = vld [vmem:[#allocation5 + $0x474] ss:$28 sps:$4 sm:$0xff]  }
 0x14f   :  { %3510 = vmatpush1.bf16.msra.mxu1 %v5475_v19  ;;  %v5523_v19 = vld [vmem:[#allocation5 + $0xb68] ss:$28 sps:$4 sm:$0xff]  }
 0x150   :  { %3640 = vmatpush1.bf16.msra.mxu0 %v5478_v21  ;;  %3511 = vmatprep.subr.bf16.mxu1 %v5483_v22  ;;  %v5526_v21 = vld [vmem:[#allocation5 + $0x470] ss:$28 sps:$4 sm:$0xff]   ;;  %v5531_v22 = vld [vmem:[#allocation5 + $0xba4] ss:$28 sps:$4 sm:$0xff]  }
 0x151   :  { %3641 = vmatprep.subr.bf16.mxu0 %v5486_v23  ;;  %v5534_v23 = vld [vmem:[#allocation5 + $0x4ac] ss:$28 sps:$4 sm:$0xff]  }
 0x153   :  { %3512 = vmatpush1.bf16.msra.mxu1 %v5481_v30  ;;  %v5529_v30 = vld [vmem:[#allocation5 + $0xba0] ss:$28 sps:$4 sm:$0xff]  }
 0x154   :  { %3642 = vmatpush1.bf16.msra.mxu0 %v5484_v31  ;;  %3513 = vmatprep.subr.bf16.mxu1 %v5489_v32  ;;  %v5532_v31 = vld [vmem:[#allocation5 + $0x4a8] ss:$28 sps:$4 sm:$0xff]   ;;  %v5537_v32 = vld [vmem:[#allocation5 + $0xbdc] ss:$28 sps:$4 sm:$0xff]  }
 0x155   :  { %3643 = vmatprep.subr.bf16.mxu0 %v5492_v33  ;;  %v5540_v33 = vld [vmem:[#allocation5 + $0x4e4] ss:$28 sps:$4 sm:$0xff]  }
 0x157   :  { %3514 = vmatpush1.bf16.msra.mxu1 %v5487_v38 }
 0x158   :  { %3644 = vmatpush1.bf16.msra.mxu0 %v5490_v39  ;;  %3515 = vmatprep.subr.bf16.mxu1 %v5495_v44  ;;  %v5535_v39 = vld [vmem:[#allocation5 + $0xbd8] ss:$28 sps:$4 sm:$0xff]   ;;  %v5538_v44 = vld [vmem:[#allocation5 + $0x4e0] ss:$28 sps:$4 sm:$0xff]  }
 0x159   :  { %3645 = vmatprep.subr.bf16.mxu0 %v5498_v46 }
 0x15b   :  { %3516 = vmatpush1.bf16.msra.mxu1 %v5493_v48 }
 0x15c   :  { %3646 = vmatpush1.bf16.msra.mxu0 %v5496_v49  ;;  %3550 = vmatprep.subr.bf16.mxu1 %v5501_v51  ;;  %v5543_v49 = vld [vmem:[#allocation5 + $0xc14] ss:$28 sps:$4 sm:$0xff]  }
 0x15d   :  { %3680 = vmatprep.subr.bf16.mxu0 %v5504_v52  ;;  %v5546_v52 = vld [vmem:[#allocation5 + $0x51c] ss:$28 sps:$4 sm:$0xff]  }
 0x15e   :  { %3518 = vmatmul.mubr.bf16.vlgmr.msra.gmra.mrb[16].mxu1 %v6087_v50 }
 0x15f   :  { %3648 = vmatmul.mubr.bf16.vlgmr.msra.gmra.mrb[32].mxu0 %v6033_v8  ;;  %3551 = vmatpush1.bf16.msra.mxu1 %v5499_v58  ;;  %v5541_v58 = vld [vmem:[#allocation5 + $0xc10] ss:$28 sps:$4 sm:$0xff]  }
 0x160   :  { %3681 = vmatpush1.bf16.msra.mxu0 %v5502_v59  ;;  %3552 = vmatprep.subr.bf16.mxu1 %v5507_v34  ;;  %v5544_v59 = vld [vmem:[#allocation5 + $0x518] ss:$28 sps:$4 sm:$0xff]   ;;  %v5549_v34 = vld [vmem:[#allocation5 + $0xc4c] ss:$28 sps:$4 sm:$0xff]  }
 0x161   :  { %3682 = vmatprep.subr.bf16.mxu0 %v5510_v37  ;;  %3525 = vmatprep.mubr.bf16.mxu1 %v6089_v62  ;;  %v5552_v37 = vld [vmem:[#allocation5 + $0x554] ss:$28 sps:$4 sm:$0xff]  }
 0x162   :  { %3653 = vmatprep.mubr.bf16.mxu0 %v6039_v25 }
 0x163   :  { %3553 = vmatpush1.bf16.msra.mxu1 %v5505_v63  ;;  %v5547_v63 = vld [vmem:[#allocation5 + $0xc48] ss:$28 sps:$4 sm:$0xff]  }
 0x164   :  { %3683 = vmatpush1.bf16.msra.mxu0 %v5508_v2  ;;  %3554 = vmatprep.subr.bf16.mxu1 %v5513_v1 }
 0x165   :  { %3684 = vmatprep.subr.bf16.mxu0 %v5516_v5  ;;  %v5550_v5 = vld [vmem:[#allocation5 + $0x550] ss:$28 sps:$4 sm:$0xff]  }
 0x166   :  { %3526 = vmatmul.mubr.bf16.gmra.mrb[20].mxu1 %v6095_v3 }
 0x167   :  { %3654 = vmatmul.mubr.bf16.gmra.mrb[36].mxu0 %v6041_v26  ;;  %3555 = vmatpush1.bf16.msra.mxu1 %v5511_v6 }
 0x168   :  { %3685 = vmatpush1.bf16.msra.mxu0 %v5514_v7  ;;  %3556 = vmatprep.subr.bf16.mxu1 %v5519_v10  ;;  %v5555_v10 = vld [vmem:[#allocation5 + $0xc84] ss:$28 sps:$4 sm:$0xff]  }
 0x169   :  { %3686 = vmatprep.subr.bf16.mxu0 %v5522_v12  ;;  %3533 = vmatprep.mubr.bf16.mxu1 %v6097_v13 }
 0x16a   :  { %3663 = vmatprep.mubr.bf16.mxu0 %v6051_v36 }
 0x16b   :  { %3557 = vmatpush1.bf16.msra.mxu1 %v5517_v14 }
 0x16c   :  { %3687 = vmatpush1.bf16.msra.mxu0 %v5520_v15  ;;  %3558 = vmatprep.subr.bf16.mxu1 %v5525_v16  ;;  %v5558_v15 = vld [vmem:[#allocation5 + $0x58c] ss:$28 sps:$4 sm:$0xff]  }
 0x16d   :  { %3688 = vmatprep.subr.bf16.mxu0 %v5528_v17 }
 0x16e   :  { %3534 = vmatmul.mubr.bf16.gmra.mrb[24].mxu1 %v6103_v20 }
 0x16f   :  { %3664 = vmatmul.mubr.bf16.gmra.mrb[40].mxu0 %v6053_v41  ;;  %3559 = vmatpush1.bf16.msra.mxu1 %v5523_v19  ;;  %v5553_v19 = vld [vmem:[#allocation5 + $0xc80] ss:$28 sps:$4 sm:$0xff]  }
 0x170   :  { %3689 = vmatpush1.bf16.msra.mxu0 %v5526_v21  ;;  %3560 = vmatprep.subr.bf16.mxu1 %v5531_v22  ;;  %v5556_v21 = vld [vmem:[#allocation5 + $0x588] ss:$28 sps:$4 sm:$0xff]   ;;  %v5561_v22 = vld [vmem:[#allocation5 + $0xcbc] ss:$28 sps:$4 sm:$0xff]  }
 0x171   :  { %3690 = vmatprep.subr.bf16.mxu0 %v5534_v23  ;;  %v6167_v38 = vpop.f32.mrb[0].mxu1  ;;  %3541 = vmatprep.mubr.bf16.mxu1 %v6105_v28  ;;  %v5564_v23 = vld [vmem:[#allocation5 + $0x5c4] ss:$28 sps:$4 sm:$0xff]  }
 0x172   :  { %3669 = vmatprep.mubr.bf16.mxu0 %v6063_v55  ;;  %v6171_v46 = vpop.f32.mrb[1].mxu1 }
 0x173   :  { %v6173_v48 = vpop.f32.mrb[2].mxu1  ;;  %3561 = vmatpush1.bf16.msra.mxu1 %v5529_v30 }
 0x174   :  { %3691 = vmatpush1.bf16.msra.mxu0 %v5532_v31  ;;  %v6175_v51 = vpop.f32.mrb[3].mxu1  ;;  %3562 = vmatprep.subr.bf16.mxu1 %v5537_v32  ;;  %v5559_v31 = vld [vmem:[#allocation5 + $0xcb8] ss:$28 sps:$4 sm:$0xff]  }
 0x175   :  { %3692 = vmatprep.subr.bf16.mxu0 %v5540_v33  ;;  %v5562_v33 = vld [vmem:[#allocation5 + $0x5c0] ss:$28 sps:$4 sm:$0xff]  }
 0x176   :  { %3542 = vmatmul.mubr.bf16.gmra.mrb[28].mxu1 %v6113_v35 }
 0x177   :  { %3670 = vmatmul.mubr.bf16.gmra.mrb[44].mxu0 %v6068_v60  ;;  %3563 = vmatpush1.bf16.msra.mxu1 %v5535_v39  ;;  %v5567_v39 = vld [vmem:[#allocation5 + $0xcf4] ss:$28 sps:$4 sm:$0xff]  }
 0x178   :  { %3693 = vmatpush1.bf16.msra.mxu0 %v5538_v44  ;;  %3564 = vmatprep.subr.bf16.mxu1 %v5543_v49  ;;  %v5570_v49 = vld [vmem:[#allocation5 + $0x5fc] ss:$28 sps:$4 sm:$0xff]  }
 0x179   :  { %3694 = vmatprep.subr.bf16.mxu0 %v5546_v52  ;;  %v3139_v2 = vpop.f32.mrb[4].mxu1  ;;  %3582 = vmatprep.mubr.bf16.mxu1 %v6119_v45 }
 0x17a   :  { %3712 = vmatprep.mubr.bf16.mxu0 %v6029_v54  ;;  %v3204_v1 = vpop.f32.mrb[4].mxu0  ;;  %v3140_v6 = vpop.f32.mrb[5].mxu1 }
 0x17b   :  { %v3205_v7 = vpop.f32.mrb[5].mxu0  ;;  %3565 = vmatpush1.bf16.msra.mxu1 %v5541_v58  ;;  %v3141_v12 = vpop.f32.mrb[6].mxu1  ;;  %v5565_v58 = vld [vmem:[#allocation5 + $0xcf0] ss:$28 sps:$4 sm:$0xff]   ;;  %v5579_v6 = vld [vmem:[#allocation5 + $0xd64] ss:$28 sps:$4 sm:$0xff]  }
 0x17c   :  { %3695 = vmatpush1.bf16.msra.mxu0 %v5544_v59  ;;  %v3206_v14 = vpop.f32.mrb[6].mxu0  ;;  %3566 = vmatprep.subr.bf16.mxu1 %v5549_v34  ;;  %v3142_v16 = vpop.f32.mrb[7].mxu1  ;;  %v5568_v59 = vld [vmem:[#allocation5 + $0x5f8] ss:$28 sps:$4 sm:$0xff]   ;;  %v5573_v34 = vld [vmem:[#allocation5 + $0xd2c] ss:$28 sps:$4 sm:$0xff]  }
 0x17d   :  { %3696 = vmatprep.subr.bf16.mxu0 %v5552_v37  ;;  %v3207_v17 = vpop.f32.mrb[7].mxu0  ;;  %v5576_v37 = vld [vmem:[#allocation5 + $0x634] ss:$28 sps:$4 sm:$0xff]  }
 0x17f   :  { %3567 = vmatpush1.bf16.msra.mxu1 %v5547_v63  ;;  %v5571_v63 = vld [vmem:[#allocation5 + $0xd28] ss:$28 sps:$4 sm:$0xff]  }
 0x180   :  { %3697 = vmatpush1.bf16.msra.mxu0 %v5550_v5  ;;  %3568 = vmatprep.subr.bf16.mxu1 %v5555_v10  ;;  %v5574_v5 = vld [vmem:[#allocation5 + $0x630] ss:$28 sps:$4 sm:$0xff]  }
 0x181   :  { %3698 = vmatprep.subr.bf16.mxu0 %v5558_v15  ;;  %v6181_v30 = vpop.f32.mrb[8].mxu1  ;;  %v5582_v15 = vld [vmem:[#allocation5 + $0x66c] ss:$28 sps:$4 sm:$0xff]  }
 0x182   :  { %v6183_v32 = vpop.f32.mrb[9].mxu1 }
 0x183   :  { %3569 = vmatpush1.bf16.msra.mxu1 %v5553_v19  ;;  %v6185_v44 = vpop.f32.mrb[10].mxu1  ;;  %v5577_v19 = vld [vmem:[#allocation5 + $0xd60] ss:$28 sps:$4 sm:$0xff]  }
 0x184   :  { %3699 = vmatpush1.bf16.msra.mxu0 %v5556_v21  ;;  %3570 = vmatprep.subr.bf16.mxu1 %v5561_v22  ;;  %v6187_v52 = vpop.f32.mrb[11].mxu1  ;;  %v5580_v21 = vld [vmem:[#allocation5 + $0x668] ss:$28 sps:$4 sm:$0xff]   ;;  %v5585_v22 = vld [vmem:[#allocation5 + $0xd9c] ss:$28 sps:$4 sm:$0xff]  }
 0x185   :  { %3700 = vmatprep.subr.bf16.mxu0 %v5564_v23  ;;  %v5588_v23 = vld [vmem:[#allocation5 + $0x6a4] ss:$28 sps:$4 sm:$0xff]  }
 0x187   :  { %3571 = vmatpush1.bf16.msra.mxu1 %v5559_v31  ;;  %v5583_v31 = vld [vmem:[#allocation5 + $0xd98] ss:$28 sps:$4 sm:$0xff]  }
 0x188   :  { %3701 = vmatpush1.bf16.msra.mxu0 %v5562_v33  ;;  %3572 = vmatprep.subr.bf16.mxu1 %v5567_v39  ;;  %v5586_v33 = vld [vmem:[#allocation5 + $0x6a0] ss:$28 sps:$4 sm:$0xff]   ;;  %v5591_v39 = vld [vmem:[#allocation5 + $0xdd4] ss:$28 sps:$4 sm:$0xff]  }
 0x189   :  { %3702 = vmatprep.subr.bf16.mxu0 %v5570_v49  ;;  %v3155_v2 = vpop.f32.mrb[12].mxu1  ;;  %v5594_v49 = vld [vmem:[#allocation5 + $0x6dc] ss:$28 sps:$4 sm:$0xff]  }
 0x18a   :  { %v3220_v1 = vpop.f32.mrb[12].mxu0  ;;  %v3156_v7 = vpop.f32.mrb[13].mxu1  ;;  %v5599_v2 = vld [vmem:[#allocation5 + $0x18] ss:$28 sps:$4 sm:$0xff]  }
 0x18b   :  { %v3221_v10 = vpop.f32.mrb[13].mxu0  ;;  %3573 = vmatpush1.bf16.msra.mxu1 %v5565_v58  ;;  %v3157_v12 = vpop.f32.mrb[14].mxu1  ;;  %v5589_v58 = vld [vmem:[#allocation5 + $0xdd0] ss:$28 sps:$4 sm:$0xff]  }
 0x18c   :  { %3703 = vmatpush1.bf16.msra.mxu0 %v5568_v59  ;;  %v3222_v14 = vpop.f32.mrb[14].mxu0  ;;  %3574 = vmatprep.subr.bf16.mxu1 %v5573_v34  ;;  %v3158_v16 = vpop.f32.mrb[15].mxu1  ;;  %v5592_v59 = vld [vmem:[#allocation5 + $0x6d8] ss:$28 sps:$4 sm:$0xff]   ;;  %v5602_v1 = vld [vmem:[#allocation5 + $0x74c] ss:$28 sps:$4 sm:$0xff]  }
 0x18d   :  { %3704 = vmatprep.subr.bf16.mxu0 %v5576_v37  ;;  %v3223_v17 = vpop.f32.mrb[15].mxu0  ;;  %v5597_v34 = vld [vmem:[#allocation5 + $0x714] ss:$28 sps:$4 sm:$0xff]   ;;  %v5607_v10 = vld [vmem:[#allocation5 + $0x784] ss:$28 sps:$4 sm:$0xff]  }
 0x18e   :  { %v5598_v37 = vld [vmem:[#allocation5 + $0x1d8] ss:$28 sps:$4 sm:$0xff]   ;;  %v5604_v7 = vld [vmem:[#allocation5 + $0x50] ss:$28 sps:$4 sm:$0xff]   ;;  %v5608_v12 = vld [vmem:[#allocation5 + $0x248] ss:$28 sps:$4 sm:$0xff]  }
 0x18f   :  { %3575 = vmatpush1.bf16.msra.mxu1 %v5571_v63  ;;  %v5595_v63 = vld [vmem:[#allocation5 + $0x710] ss:$28 sps:$4 sm:$0xff]   ;;  %v5605_v14 = vld [vmem:[#allocation5 + $0x780] ss:$28 sps:$4 sm:$0xff]  }
 0x190   :  { %3705 = vmatpush1.bf16.msra.mxu0 %v5574_v5  ;;  %3576 = vmatprep.subr.bf16.mxu1 %v5579_v6  ;;  %v5603_v5 = vld [vmem:[#allocation5 + $0x210] ss:$28 sps:$4 sm:$0xff]   ;;  %v5600_v6 = vld [vmem:[#allocation5 + $0x748] ss:$28 sps:$4 sm:$0xff]   ;;  %v5612_v16 = vld [vmem:[#allocation5 + $0x7bc] ss:$28 sps:$4 sm:$0xff]  }
 0x191   :  { %3706 = vmatprep.subr.bf16.mxu0 %v5582_v15  ;;  %v5609_v15 = vld [vmem:[#allocation5 + $0x88] ss:$28 sps:$4 sm:$0xff]   ;;  %v5613_v17 = vld [vmem:[#allocation5 + $0x280] ss:$28 sps:$4 sm:$0xff]  }
 0x193   :  { %3577 = vmatpush1.bf16.msra.mxu1 %v5577_v19  ;;  %v5610_v19 = vld [vmem:[#allocation5 + $0x7b8] ss:$28 sps:$4 sm:$0xff]  }
 0x194   :  { %3707 = vmatpush1.bf16.msra.mxu0 %v5580_v21  ;;  %3578 = vmatprep.subr.bf16.mxu1 %v5585_v22  ;;  %v5614_v21 = vld [vmem:[#allocation5 + $0xc0] ss:$28 sps:$4 sm:$0xff]   ;;  %v5617_v22 = vld [vmem:[#allocation5 + $0x7f4] ss:$28 sps:$4 sm:$0xff]  }
 0x195   :  { %3708 = vmatprep.subr.bf16.mxu0 %v5588_v23  ;;  %v5618_v23 = vld [vmem:[#allocation5 + $0x2b8] ss:$28 sps:$4 sm:$0xff]  }
 0x197   :  { %3579 = vmatpush1.bf16.msra.mxu1 %v5583_v31  ;;  %v5615_v31 = vld [vmem:[#allocation5 + $0x7f0] ss:$28 sps:$4 sm:$0xff]  }
 0x198   :  { %3709 = vmatpush1.bf16.msra.mxu0 %v5586_v33  ;;  %3580 = vmatprep.subr.bf16.mxu1 %v5591_v39  ;;  %v5619_v33 = vld [vmem:[#allocation5 + $0xf8] ss:$28 sps:$4 sm:$0xff]   ;;  %v5622_v39 = vld [vmem:[#allocation5 + $0x82c] ss:$28 sps:$4 sm:$0xff]  }
 0x199   :  { %3710 = vmatprep.subr.bf16.mxu0 %v5594_v49  ;;  %v5623_v49 = vld [vmem:[#allocation5 + $0x2f0] ss:$28 sps:$4 sm:$0xff]  }
 0x19b   :  { %3581 = vmatpush1.bf16.msra.mxu1 %v5589_v58  ;;  %v5620_v58 = vld [vmem:[#allocation5 + $0x828] ss:$28 sps:$4 sm:$0xff]  }
 0x19c   :  { %3711 = vmatpush1.bf16.msra.mxu0 %v5592_v59  ;;  %4846 = vmatprep.subr.bf16.mxu1 %v5598_v37  ;;  %v5624_v59 = vld [vmem:[#allocation5 + $0x130] ss:$28 sps:$4 sm:$0xff]   ;;  %v5628_v37 = vld [vmem:[#allocation5 + $0x328] ss:$28 sps:$4 sm:$0xff]  }
 0x19d   :  { %3745 = vmatprep.subr.bf16.mxu0 %v5597_v34  ;;  %v5627_v34 = vld [vmem:[#allocation5 + $0x864] ss:$28 sps:$4 sm:$0xff]  }
 0x19e   :  { %3583 = vmatmul.mubr.bf16.vlgmr.msra.gmra.mrb[16].mxu1 %v6127_v47 }
 0x19f   :  { %3713 = vmatmul.mubr.bf16.vlgmr.msra.gmra.mrb[48].mxu0 %v6035_v11  ;;  %4847 = vmatpush3.bf16.msra.mxu1 %v5599_v2  ;;  %v5629_v2 = vld [vmem:[#allocation5 + $0x168] ss:$28 sps:$4 sm:$0xff]  }
 0x1a0   :  { %3746 = vmatpush1.bf16.msra.mxu0 %v5595_v63  ;;  %4848 = vmatprep.subr.bf16.mxu1 %v5603_v5  ;;  %v5625_v63 = vld [vmem:[#allocation5 + $0x860] ss:$28 sps:$4 sm:$0xff]  }
 0x1a1   :  { %3747 = vmatprep.subr.bf16.mxu0 %v5602_v1  ;;  %3590 = vmatprep.mubr.bf16.mxu1 %v6129_v56  ;;  %v5632_v1 = vld [vmem:[#allocation5 + $0x89c] ss:$28 sps:$4 sm:$0xff]  }
 0x1a2   :  { %3718 = vmatprep.mubr.bf16.mxu0 %v6043_v27  ;;  %v5633_v5 = vld [vmem:[#allocation5 + $0x360] ss:$28 sps:$4 sm:$0xff]  }
 0x1a3   :  { %4849 = vmatpush3.bf16.msra.mxu1 %v5604_v7  ;;  %v5634_v7 = vld [vmem:[#allocation5 + $0x1a0] ss:$28 sps:$4 sm:$0xff]  }
 0x1a4   :  { %3748 = vmatpush1.bf16.msra.mxu0 %v5600_v6  ;;  %4850 = vmatprep.subr.bf16.mxu1 %v5608_v12  ;;  %v5630_v6 = vld [vmem:[#allocation5 + $0x898] ss:$28 sps:$4 sm:$0xff]  }
 0x1a5   :  { %3749 = vmatprep.subr.bf16.mxu0 %v5607_v10  ;;  %v5637_v10 = vld [vmem:[#allocation5 + $0x8d4] ss:$28 sps:$4 sm:$0xff]  }
 0x1a6   :  { %3591 = vmatmul.mubr.bf16.gmra.mrb[20].mxu1 %v6135_v0  ;;  %v5638_v12 = vld [vmem:[#allocation5 + $0x558] ss:$28 sps:$4 sm:$0xff]  }
 0x1a7   :  { %3719 = vmatmul.mubr.bf16.gmra.mrb[36].mxu0 %v6045_v29  ;;  %4851 = vmatpush3.bf16.msra.mxu1 %v5609_v15 }
 0x1a8   :  { %3750 = vmatpush1.bf16.msra.mxu0 %v5605_v14  ;;  %4852 = vmatprep.subr.bf16.mxu1 %v5613_v17  ;;  %v5639_v17 = vld [vmem:[#allocation5 + $0x398] ss:$28 sps:$4 sm:$0xff]  }
 0x1a9   :  { %3751 = vmatprep.subr.bf16.mxu0 %v5612_v16  ;;  %3598 = vmatprep.mubr.bf16.mxu1 %v6137_v9  ;;  %v5635_v16 = vld [vmem:[#allocation5 + $0x8d0] ss:$28 sps:$4 sm:$0xff]  }
 0x1aa   :  { %3728 = vmatprep.mubr.bf16.mxu0 %v6055_v42 }
 0x1ab   :  { %4853 = vmatpush3.bf16.msra.mxu1 %v5614_v21  ;;  %v5642_v21 = vld [vmem:[#allocation5 + $0x90c] ss:$28 sps:$4 sm:$0xff]  }
 0x1ac   :  { %3752 = vmatpush1.bf16.msra.mxu0 %v5610_v19  ;;  %4854 = vmatprep.subr.bf16.mxu1 %v5618_v23 }
 0x1ad   :  { %3753 = vmatprep.subr.bf16.mxu0 %v5617_v22  ;;  %v5643_v22 = vld [vmem:[#allocation5 + $0x590] ss:$28 sps:$4 sm:$0xff]  }
 0x1ae   :  { %3599 = vmatmul.mubr.bf16.gmra.mrb[24].mxu1 %v6143_v18 }
 0x1af   :  { %3729 = vmatmul.mubr.bf16.gmra.mrb[52].mxu0 %v6057_v43  ;;  %4855 = vmatpush3.bf16.msra.mxu1 %v5619_v33  ;;  %v5647_v33 = vld [vmem:[#allocation5 + $0x944] ss:$28 sps:$4 sm:$0xff]  }
 0x1b0   :  { %3754 = vmatpush1.bf16.msra.mxu0 %v5615_v31  ;;  %4856 = vmatprep.subr.bf16.mxu1 %v5623_v49  ;;  %v5640_v31 = vld [vmem:[#allocation5 + $0x908] ss:$28 sps:$4 sm:$0xff]   ;;  %v5645_v49 = vld [vmem:[#allocation5 + $0x940] ss:$28 sps:$4 sm:$0xff]  }
 0x1b1   :  { %3755 = vmatprep.subr.bf16.mxu0 %v5622_v39  ;;  %3606 = vmatprep.mubr.bf16.mxu1 %v6145_v24  ;;  %v5648_v39 = vld [vmem:[#allocation5 + $0x5c8] ss:$28 sps:$4 sm:$0xff]  }
 0x1b2   :  { %3734 = vmatprep.mubr.bf16.mxu0 %v6065_v57 }
 0x1b3   :  { %4857 = vmatpush3.bf16.msra.mxu1 %v5624_v59  ;;  %v5652_v59 = vld [vmem:[#allocation5 + $0x97c] ss:$28 sps:$4 sm:$0xff]  }
 0x1b4   :  { %3756 = vmatpush1.bf16.msra.mxu0 %v5620_v58  ;;  %4858 = vmatprep.subr.bf16.mxu1 %v5628_v37  ;;  %v5649_v58 = vld [vmem:[#allocation5 + $0x408] ss:$28 sps:$4 sm:$0xff]   ;;  %v5654_v37 = vld [vmem:[#allocation5 + $0x440] ss:$28 sps:$4 sm:$0xff]  }
 0x1b5   :  { %3757 = vmatprep.subr.bf16.mxu0 %v5627_v34  ;;  %v5653_v34 = vld [vmem:[#allocation5 + $0x600] ss:$28 sps:$4 sm:$0xff]  }
 0x1b6   :  { %3607 = vmatmul.mubr.bf16.gmra.mrb[28].mxu1 %v6151_v40 }
 0x1b7   :  { %3735 = vmatmul.mubr.bf16.gmra.mrb[44].mxu0 %v6070_v61  ;;  %4859 = vmatpush3.bf16.msra.mxu1 %v5629_v2  ;;  %v5658_v2 = vld [vmem:[#allocation5 + $0x638] ss:$28 sps:$4 sm:$0xff]  }
 0x1b8   :  { %3758 = vmatpush1.bf16.msra.mxu0 %v5625_v63  ;;  %4860 = vmatprep.subr.bf16.mxu1 %v5633_v5  ;;  %v5657_v63 = vld [vmem:[#allocation5 + $0x9b4] ss:$28 sps:$4 sm:$0xff]  }
 0x1b9   :  { %3759 = vmatprep.subr.bf16.mxu0 %v5632_v1  ;;  %3907 = vmatprep.mubr.bf16.mxu1 %v6027_v53  ;;  %v5644_v53 = vld [vmem:[#allocation5 + $0x3d0] ss:$28 sps:$4 sm:$0xff]  }
 0x1ba   :  { %3777 = vmatprep.mubr.bf16.mxu0 %v6081_v4  ;;  %v3269_v14 = vpop.f32.mrb[16].mxu0  ;;  %v5655_v5 = vld [vmem:[#allocation5 + $0x9b0] ss:$28 sps:$4 sm:$0xff]  }
 0x1bb   :  { %v3270_v15 = vpop.f32.mrb[17].mxu0  ;;  %4861 = vmatpush3.bf16.msra.mxu1 %v5634_v7  ;;  %v5660_v14 = vld [vmem:[#allocation5 + $0x9e8] ss:$28 sps:$4 sm:$0xff]  }
 0x1bc   :  { %3760 = vmatpush1.bf16.msra.mxu0 %v5630_v6  ;;  %v3271_v19 = vpop.f32.mrb[18].mxu0  ;;  %4886 = vmatprep.subr.bf16.mxu1 %v5638_v12  ;;  %v5659_v6 = vld [vmem:[#allocation5 + $0x478] ss:$28 sps:$4 sm:$0xff]   ;;  %v5664_v15 = vld [vmem:[#allocation5 + $0x4b0] ss:$28 sps:$4 sm:$0xff]  }
 0x1bd   :  { %3761 = vmatprep.subr.bf16.mxu0 %v5637_v10  ;;  %v3272_v23 = vpop.f32.mrb[19].mxu0  ;;  %v5663_v10 = vld [vmem:[#allocation5 + $0x670] ss:$28 sps:$4 sm:$0xff]   ;;  %v5669_v19 = vld [vmem:[#allocation5 + $0x4e8] ss:$28 sps:$4 sm:$0xff]  }
 0x1be   :  { %3908 = vmatmul.mubr.bf16.vlgmr.msra.gmra.mrb[32].mxu1 %v6033_v8  ;;  %v5650_v8 = vld [vmem:[#allocation5 + $0x978] ss:$28 sps:$4 sm:$0xff]   ;;  %v5674_v23 = vld [vmem:[#allocation5 + $0x520] ss:$28 sps:$4 sm:$0xff]  }
 0x1bf   :  { %4887 = vmatpush3.bf16.msra.mxu1 %v5639_v17  ;;  %3915 = vmatprep.mubr.bf16.mxu1 %v6039_v25  ;;  %v5665_v17 = vld [vmem:[#allocation5 + $0xa20] ss:$28 sps:$4 sm:$0xff]  }
 0x1c0   :  { %3762 = vmatpush1.bf16.msra.mxu0 %v5635_v16  ;;  %4888 = vmatprep.subr.bf16.mxu1 %v5643_v22  ;;  %v5668_v16 = vld [vmem:[#allocation5 + $0x6a8] ss:$28 sps:$4 sm:$0xff]   ;;  %v5673_v22 = vld [vmem:[#allocation5 + $0x6e0] ss:$28 sps:$4 sm:$0xff]  }
 0x1c1   :  { %3763 = vmatprep.subr.bf16.mxu0 %v5642_v21  ;;  %v5672_v21 = vld [vmem:[#allocation5 + $0xa5c] ss:$28 sps:$4 sm:$0xff]  }
 0x1c3   :  { %4889 = vmatpush3.bf16.msra.mxu1 %v5644_v53  ;;  %v5678_v53 = vld [vmem:[#allocation5 + $0x8d8] ss:$28 sps:$4 sm:$0xff]  }
 0x1c4   :  { %3764 = vmatpush1.bf16.msra.mxu0 %v5640_v31  ;;  %4890 = vmatprep.subr.bf16.mxu1 %v5648_v39  ;;  %v5677_v31 = vld [vmem:[#allocation5 + $0xa94] ss:$28 sps:$4 sm:$0xff]   ;;  %v5682_v39 = vld [vmem:[#allocation5 + $0xacc] ss:$28 sps:$4 sm:$0xff]  }
 0x1c5   :  { %3765 = vmatprep.subr.bf16.mxu0 %v5647_v33  ;;  %v5679_v33 = vld [vmem:[#allocation5 + $0x718] ss:$28 sps:$4 sm:$0xff]  }
 0x1c6   :  { %3916 = vmatmul.mubr.bf16.gmra.mrb[36].mxu1 %v6041_v26  ;;  %v5662_v26 = vld [vmem:[#allocation5 + $0x9ec] ss:$28 sps:$4 sm:$0xff]  }
 0x1c7   :  { %4891 = vmatpush3.bf16.msra.mxu1 %v5649_v58  ;;  %3923 = vmatprep.mubr.bf16.mxu1 %v6051_v36  ;;  %v5667_v36 = vld [vmem:[#allocation5 + $0xa24] ss:$28 sps:$4 sm:$0xff]   ;;  %v5684_v58 = vld [vmem:[#allocation5 + $0x750] ss:$28 sps:$4 sm:$0xff]  }
 0x1c8   :  { %3766 = vmatpush1.bf16.msra.mxu0 %v5645_v49  ;;  %4892 = vmatprep.subr.bf16.mxu1 %v5653_v34  ;;  %v5683_v49 = vld [vmem:[#allocation5 + $0x910] ss:$28 sps:$4 sm:$0xff]   ;;  %v5685_v34 = vld [vmem:[#allocation5 + $0xb00] ss:$28 sps:$4 sm:$0xff]  }
 0x1c9   :  { %3767 = vmatprep.subr.bf16.mxu0 %v5652_v59  ;;  %v5687_v59 = vld [vmem:[#allocation5 + $0xb04] ss:$28 sps:$4 sm:$0xff]  }
 0x1ca   :  { %v3285_v25 = vpop.f32.mrb[20].mxu0 }
 0x1cb   :  { %v3286_v1 = vpop.f32.mrb[21].mxu0  ;;  %4893 = vmatpush3.bf16.msra.mxu1 %v5654_v37  ;;  %v5693_v37 = vld [vmem:[#allocation5 + $0x980] ss:$28 sps:$4 sm:$0xff]  }
 0x1cc   :  { %3768 = vmatpush1.bf16.msra.mxu0 %v5650_v8  ;;  %v3287_v7 = vpop.f32.mrb[22].mxu0  ;;  %4894 = vmatprep.subr.bf16.mxu1 %v5658_v2  ;;  %v5689_v8 = vld [vmem:[#allocation5 + $0x788] ss:$28 sps:$4 sm:$0xff]   ;;  %v5690_v2 = vld [vmem:[#allocation5 + $0xb38] ss:$28 sps:$4 sm:$0xff]  }
 0x1cd   :  { %3769 = vmatprep.subr.bf16.mxu0 %v5657_v63  ;;  %v3288_v12 = vpop.f32.mrb[23].mxu0  ;;  %v4137_v63 = vlaneseq  ;;  %v5694_v25 = vld [vmem:[#allocation5 + $0x7c0] ss:$28 sps:$4 sm:$0xff]   ;;  %v5698_v1 = vld [vmem:[#allocation5 + $0x9b8] ss:$28 sps:$4 sm:$0xff]  }
 0x1ce   :  { %3924 = vmatmul.mubr.bf16.gmra.mrb[40].mxu1 %v6053_v41  ;;  %v5670_v41 = vld [vmem:[#allocation5 + $0xa58] ss:$28 sps:$4 sm:$0xff]   ;;  %v6224_v12 = vld [vmem:[#allocation7] sm:$0x3f] }
 0x1cf   :  { %4895 = vmatpush3.bf16.msra.mxu1 %v5659_v6  ;;  %3931 = vmatprep.mubr.bf16.mxu1 %v6063_v55  ;;  %v5675_v55 = vld [vmem:[#allocation5 + $0xa90] ss:$28 sps:$4 sm:$0xff]  }
 0x1d0   :  { %3770 = vmatpush1.bf16.msra.mxu0 %v5655_v5  ;;  %4896 = vmatprep.subr.bf16.mxu1 %v5663_v10  ;;  %v6219_v5 = vshrl.u32 %v4137_v63, 7  ;;  %v5695_v6 = vld [vmem:[#allocation5 + $0xb70] ss:$28 sps:$4 sm:$0xff]  }
 0x1d1   :  { %3771 = vmatprep.subr.bf16.mxu0 %v5662_v26  ;;  %v5702_v26 = vld [vmem:[#allocation5 + $0xbac] ss:$28 sps:$4 sm:$0xff]  }
 0x1d2   :  { %v4139_v7 = vsub.s32 0, %v6219_v5  ;;  %v5703_v10 = vld [vmem:[#allocation5 + $0x9f0] ss:$28 sps:$4 sm:$0xff]  }
 0x1d3   :  { %4897 = vmatpush3.bf16.msra.mxu1 %v5664_v15  ;;  %v5700_v15 = vld [vmem:[#allocation5 + $0xba8] ss:$28 sps:$4 sm:$0xff]  }
 0x1d4   :  { %3772 = vmatpush1.bf16.msra.mxu0 %v5660_v14  ;;  %4898 = vmatprep.subr.bf16.mxu1 %v5668_v16  ;;  %v4143_v14 = vsub.s32 1, %v6219_v5  ;;  %v6232_v16 = vrot.slane %v6224_v12, %v4139_v7 }
 0x1d5   :  { %3773 = vmatprep.subr.bf16.mxu0 %v5667_v36  ;;  %v5704_v36 = vld [vmem:[#allocation5 + $0x830] ss:$28 sps:$4 sm:$0xff]  }
 0x1d6   :  { %3932 = vmatmul.mubr.bf16.gmra.mrb[44].mxu1 %v6068_v60  ;;  %v5680_v60 = vld [vmem:[#allocation5 + $0xac8] ss:$28 sps:$4 sm:$0xff]  }
 0x1d7   :  { %4899 = vmatpush3.bf16.msra.mxu1 %v5669_v19  ;;  %3972 = vmatprep.mubr.bf16.mxu1 %v6029_v54  ;;  %v5688_v54 = vld [vmem:[#allocation5 + $0x948] ss:$28 sps:$4 sm:$0xff]  }
 0x1d8   :  { %3774 = vmatpush1.bf16.msra.mxu0 %v5665_v17  ;;  %4900 = vmatprep.subr.bf16.mxu1 %v5673_v22  ;;  %v5707_v17 = vld [vmem:[#allocation5 + $0xbe4] ss:$28 sps:$4 sm:$0xff]   ;;  %v6235_v22 = vrot.slane %v6224_v12, %v4143_v14 }
 0x1d9   :  { %3775 = vmatprep.subr.bf16.mxu0 %v5672_v21  ;;  %v5708_v19 = vld [vmem:[#allocation5 + $0xa28] ss:$28 sps:$4 sm:$0xff]  }
 0x1db   :  { %4901 = vmatpush3.bf16.msra.mxu1 %v5674_v23 }
 0x1dc   :  { %3776 = vmatpush1.bf16.msra.mxu0 %v5670_v41  ;;  %4926 = vmatprep.subr.bf16.mxu1 %v5678_v53 }
 0x1dd   :  { %3810 = vmatprep.subr.bf16.mxu0 %v5677_v31 }
 0x1de   :  { %3973 = vmatmul.mubr.bf16.vlgmr.msra.gmra.mrb[48].mxu1 %v6035_v11  ;;  %v5692_v11 = vld [vmem:[#allocation5 + $0xb3c] ss:$28 sps:$4 sm:$0xff]  }
 0x1df   :  { %3778 = vmatmul.mubr.bf16.vlgmr.msra.gmra.mrb[56].mxu0 %v6087_v50  ;;  %4927 = vmatpush3.bf16.msra.mxu1 %v5679_v33  ;;  %v5705_v33 = vld [vmem:[#allocation5 + $0xbe0] ss:$28 sps:$4 sm:$0xff]  }
 0x1e0   :  { %3811 = vmatpush1.bf16.msra.mxu0 %v5675_v55  ;;  %4928 = vmatprep.subr.bf16.mxu1 %v5683_v49 }
 0x1e1   :  { %3812 = vmatprep.subr.bf16.mxu0 %v5682_v39  ;;  %3980 = vmatprep.mubr.bf16.mxu1 %v6043_v27  ;;  %v5697_v27 = vld [vmem:[#allocation5 + $0xb74] ss:$28 sps:$4 sm:$0xff]   ;;  %v5709_v39 = vld [vmem:[#allocation5 + $0x868] ss:$28 sps:$4 sm:$0xff]  }
 0x1e2   :  { %3783 = vmatprep.mubr.bf16.mxu0 %v6089_v62 }
 0x1e3   :  { %4929 = vmatpush3.bf16.msra.mxu1 %v5684_v58  ;;  %v5713_v58 = vld [vmem:[#allocation5 + $0xa60] ss:$28 sps:$4 sm:$0xff]  }
 0x1e4   :  { %3813 = vmatpush1.bf16.msra.mxu0 %v5680_v60  ;;  %4930 = vmatprep.subr.bf16.mxu1 %v5688_v54 }
 0x1e5   :  { %3814 = vmatprep.subr.bf16.mxu0 %v5687_v59 }
 0x1e6   :  { %3981 = vmatmul.mubr.bf16.gmra.mrb[52].mxu1 %v6045_v29  ;;  %v5699_v29 = vld [vmem:[#allocation5 + $0x7f8] ss:$28 sps:$4 sm:$0xff]  }
 0x1e7   :  { %3784 = vmatmul.mubr.bf16.gmra.mrb[36].mxu0 %v6095_v3  ;;  %4931 = vmatpush3.bf16.msra.mxu1 %v5689_v8 }
 0x1e8   :  { %3815 = vmatpush1.bf16.msra.mxu0 %v5685_v34  ;;  %4932 = vmatprep.subr.bf16.mxu1 %v5693_v37  ;;  %v5714_v37 = vld [vmem:[#allocation5 + $0x8a0] ss:$28 sps:$4 sm:$0xff]  }
 0x1e9   :  { %3816 = vmatprep.subr.bf16.mxu0 %v5692_v11  ;;  %3988 = vmatprep.mubr.bf16.mxu1 %v6055_v42  ;;  %v6229_v42 = vld [vmem:[#allocation8] sm:$0x3f]  ;;  %v5710_v11 = vld [vmem:[#allocation5 + $0xc18] ss:$28 sps:$4 sm:$0xff]  }
 0x1ea   :  { %3793 = vmatprep.mubr.bf16.mxu0 %v6097_v13  ;;  %v6241_v41 = vrot.slane %v6229_v42, %v4139_v7  ;;  %v6245_v53 = vrot.slane %v6229_v42, %v4143_v14  ;;  %v5719_v14 = vld [vmem:[#allocation5 + $0xa98] ss:$28 sps:$4 sm:$0xff]  }
 0x1eb   :  { %4933 = vmatpush3.bf16.msra.mxu1 %v5694_v25  ;;  %v5718_v25 = vld [vmem:[#allocation5 + $0xc58] ss:$28 sps:$4 sm:$0xff]  }
 0x1ec   :  { %3817 = vmatpush1.bf16.msra.mxu0 %v5690_v2  ;;  %4934 = vmatprep.subr.bf16.mxu1 %v5698_v1 }
 0x1ed   :  { %3818 = vmatprep.subr.bf16.mxu0 %v5697_v27 }
 0x1ee   :  { %3989 = vmatmul.mubr.bf16.gmra.mrb[56].mxu1 %v6057_v43 }
 0x1ef   :  { %3794 = vmatmul.mubr.bf16.gmra.mrb[60].mxu0 %v6103_v20  ;;  %4935 = vmatpush3.bf16.msra.mxu1 %v5699_v29 }
 0x1f0   :  { %3819 = vmatpush1.bf16.msra.mxu0 %v5695_v6  ;;  %4936 = vmatprep.subr.bf16.mxu1 %v5703_v10 }
 0x1f1   :  { %3820 = vmatprep.subr.bf16.mxu0 %v5702_v26  ;;  %3996 = vmatprep.mubr.bf16.mxu1 %v6065_v57  ;;  %v5715_v26 = vld [vmem:[#allocation5 + $0xc50] ss:$28 sps:$4 sm:$0xff]  }
 0x1f2   :  { %v3324_v21 = vpop.f32.mrb[0].mxu0  ;;  %3799 = vmatprep.mubr.bf16.mxu0 %v6105_v28 }
 0x1f3   :  { %v5006_v43 = vadd.f32 %v3324_v21, %v6167_v38  ;;  %v3326_v23 = vpop.f32.mrb[1].mxu0  ;;  %4937 = vmatpush3.bf16.msra.mxu1 %v5704_v36  ;;  %v5712_v38 = vld [vmem:[#allocation5 + $0xc1c] ss:$28 sps:$4 sm:$0xff]   ;;  %v5722_v36 = vld [vmem:[#allocation5 + $0xc8c] ss:$28 sps:$4 sm:$0xff]  }
 0x1f4   :  { %v5007_v31 = vadd.f32 %v3326_v23, %v6171_v46  ;;  %v3328_v55 = vpop.f32.mrb[2].mxu0  ;;  %3821 = vmatpush1.bf16.msra.mxu0 %v5700_v15  ;;  %4938 = vmatprep.subr.bf16.mxu1 %v5708_v19  ;;  %v5724_v19 = vld [vmem:[#allocation5 + $0xad0] ss:$28 sps:$4 sm:$0xff]   ;;  %v5727_v21 = vld [vmem:[#allocation5 + $0xcc4] ss:$28 sps:$4 sm:$0xff]  }
 0x1f5   :  { %v4167_v57 = vmul.f32 %v5006_v43, %v6232_v16  ;;  %v5008_v49 = vadd.f32 %v3328_v55, %v6173_v48  ;;  %v3330_v60 = vpop.f32.mrb[3].mxu0  ;;  %3822 = vmatprep.subr.bf16.mxu0 %v5707_v17  ;;  %v5723_v17 = vld [vmem:[#allocation5 + $0xc90] ss:$28 sps:$4 sm:$0xff]   ;;  %v5728_v43 = vld [vmem:[#allocation5 + $0xcc8] ss:$28 sps:$4 sm:$0xff]  }
 0x1f6   :  { %v4168_v59 = vmul.f32 %v5007_v31, %v6235_v22  ;;  %v5009_v46 = vadd.f32 %v3330_v60, %v6175_v51  ;;  %3997 = vmatmul.mubr.bf16.gmra.mrb[60].mxu1 %v6070_v61  ;;  %v5717_v51 = vld [vmem:[#allocation5 + $0xc54] ss:$28 sps:$4 sm:$0xff]  }
 0x1f7   :  { %v4223_v54 = vadd.f32 %v6241_v41, %v4167_v57  ;;  %v4169_v34 = vmul.f32 %v5008_v49, %v6232_v16  ;;  %3800 = vmatmul.mubr.bf16.gmra.mrb[44].mxu0 %v6113_v35  ;;  %4939 = vmatpush3.bf16.msra.mxu1 %v5709_v39  ;;  %v5729_v57 = vld [vmem:[#allocation5 + $0xb08] ss:$28 sps:$4 sm:$0xff]  }
 0x1f8   :  { %v4224_v8 = vadd.f32 %v6245_v53, %v4168_v59  ;;  %v4170_v48 = vmul.f32 %v5009_v46, %v6235_v22  ;;  %3823 = vmatpush1.bf16.msra.mxu0 %v5705_v33  ;;  %4940 = vmatprep.subr.bf16.mxu1 %v5713_v58  ;;  %v5732_v58 = vld [vmem:[#allocation5 + $0xcfc] ss:$28 sps:$4 sm:$0xff]  }
 0x1f9   :  { %v4247_v63 = vmax.f32 %v4223_v54, 0.0  ;;  %v4225_v2 = vadd.f32 %v6241_v41, %v4169_v34  ;;  %3824 = vmatprep.subr.bf16.mxu0 %v5712_v38  ;;  %4037 = vmatprep.mubr.bf16.mxu1 %v6081_v4  ;;  %v5720_v4 = vld [vmem:[#allocation5 + $0xc88] ss:$28 sps:$4 sm:$0xff]   ;;  %v5733_v59 = vld [vmem:[#allocation5 + $0xd00] ss:$28 sps:$4 sm:$0xff]  }
 0x1fa   :  { %v4248_v27 = vmax.f32 %v4224_v8, 0.0  ;;  %v4226_v61 = vadd.f32 %v6245_v53, %v4170_v48  ;;  %v3334_v1 = vpop.f32.mrb[24].mxu0  ;;  %3842 = vmatprep.mubr.bf16.mxu0 %v6119_v45  ;;  %v5734_v8 = vld [vmem:[#allocation5 + $0xb40] ss:$28 sps:$4 sm:$0xff]  }
 0x1fb   :  { %4271 = vst [vmem:[#allocation12] sm:$0xff] %v4247_v63  ;;  %v4249_v6 = vmax.f32 %v4225_v2, 0.0  ;;  %v3335_v29 = vpop.f32.mrb[25].mxu0  ;;  %4941 = vmatpush3.bf16.msra.mxu1 %v5714_v37  ;;  %v5738_v37 = vld [vmem:[#allocation5 + $0xd38] ss:$28 sps:$4 sm:$0xff]  }
 0x1fc   :  { %4272 = vst [vmem:[#allocation12 + $0x8] sm:$0xff] %v4248_v27  ;;  %v4250_v7 = vmax.f32 %v4226_v61, 0.0  ;;  %3825 = vmatpush1.bf16.msra.mxu0 %v5710_v11  ;;  %v3336_v10 = vpop.f32.mrb[26].mxu0  ;;  %4966 = vmatprep.subr.bf16.mxu1 %v5718_v25  ;;  %v5735_v25 = vld [vmem:[#allocation5 + $0xd30] ss:$28 sps:$4 sm:$0xff]  }
 0x1fd   :  { %4273 = vst [vmem:[#allocation12 + $0x10] sm:$0xff] %v4249_v6  ;;  %3826 = vmatprep.subr.bf16.mxu0 %v5717_v51  ;;  %v3337_v15 = vpop.f32.mrb[27].mxu0  ;;  %v5739_v27 = vld [vmem:[#allocation5 + $0xb78] ss:$28 sps:$4 sm:$0xff]   ;;  %v5742_v61 = vld [vmem:[#allocation5 + $0xd6c] ss:$28 sps:$4 sm:$0xff]  }
 0x1fe   :  { %4274 = vst [vmem:[#allocation12 + $0x18] sm:$0xff] %v4250_v7  ;;  %4038 = vmatmul.mubr.bf16.vlgmr.msra.gmra.mrb[64].mxu1 %v6087_v50  ;;  %v5725_v50 = vld [vmem:[#allocation5 + $0xcc0] ss:$28 sps:$4 sm:$0xff]   ;;  %v5743_v1 = vld [vmem:[#allocation5 + $0xd70] ss:$28 sps:$4 sm:$0xff]  }
 0x1ff   :  { %4967 = vmatpush3.bf16.msra.mxu1 %v5719_v14  ;;  %4045 = vmatprep.mubr.bf16.mxu1 %v6089_v62  ;;  %v5747_v29 = vld [vmem:[#allocation5 + $0xda4] ss:$28 sps:$4 sm:$0xff]   ;;  %v5752_v14 = vld [vmem:[#allocation5 + $0xddc] ss:$28 sps:$4 sm:$0xff]  }
 0x200   :  { %3827 = vmatpush1.bf16.msra.mxu0 %v5715_v26  ;;  %4968 = vmatprep.subr.bf16.mxu1 %v5723_v17  ;;  %v5748_v7 = vld [vmem:[#allocation5 + $0xda8] ss:$28 sps:$4 sm:$0xff]   ;;  %v5745_v26 = vld [vmem:[#allocation5 + $0xda0] ss:$28 sps:$4 sm:$0xff]  }
 0x201   :  { %3828 = vmatprep.subr.bf16.mxu0 %v5722_v36  ;;  %v5749_v10 = vld [vmem:[#allocation5 + $0xbe8] ss:$28 sps:$4 sm:$0xff]   ;;  %v5753_v15 = vld [vmem:[#allocation5 + $0xde0] ss:$28 sps:$4 sm:$0xff]  }
 0x202   :  { %v3340_v23 = vpop.f32.mrb[8].mxu0  ;;  %v5754_v36 = vld [vmem:[#allocation5 + $0xc20] ss:$28 sps:$4 sm:$0xff]  }
 0x203   :  { %v5010_v31 = vadd.f32 %v3340_v23, %v6181_v30  ;;  %v3342_v55 = vpop.f32.mrb[9].mxu0  ;;  %4969 = vmatpush3.bf16.msra.mxu1 %v5724_v19 }
 0x204   :  { %v5011_v33 = vadd.f32 %v3342_v55, %v6183_v32  ;;  %v3344_v39 = vpop.f32.mrb[10].mxu0  ;;  %3829 = vmatpush1.bf16.msra.mxu0 %v5720_v4  ;;  %4970 = vmatprep.subr.bf16.mxu1 %v5728_v43  ;;  %v4147_v4 = vsub.s32 2, %v6219_v5 }
 0x205   :  { %v4179_v49 = vmul.f32 %v5010_v31, %v6232_v16  ;;  %v5012_v60 = vadd.f32 %v3344_v39, %v6185_v44  ;;  %v3346_v38 = vpop.f32.mrb[11].mxu0  ;;  %3830 = vmatprep.subr.bf16.mxu0 %v5727_v21  ;;  %v5730_v44 = vld [vmem:[#allocation5 + $0xcf8] ss:$28 sps:$4 sm:$0xff]  }
 0x206   :  { %v4180_v62 = vmul.f32 %v5011_v33, %v6235_v22  ;;  %v5013_v30 = vadd.f32 %v3346_v38, %v6187_v52  ;;  %4046 = vmatmul.mubr.bf16.gmra.mrb[68].mxu1 %v6095_v3  ;;  %v5737_v52 = vld [vmem:[#allocation5 + $0xd34] ss:$28 sps:$4 sm:$0xff]   ;;  %v4148_v19 = vrot.slane %v6224_v12, %v4147_v4  ;;  %v4204_v31 = vrot.slane %v6229_v42, %v4147_v4 }
 0x207   :  { %v4235_v32 = vadd.f32 %v6241_v41, %v4179_v49  ;;  %v4181_v46 = vmul.f32 %v5012_v60, %v6232_v16  ;;  %4971 = vmatpush3.bf16.msra.mxu1 %v5729_v57  ;;  %4053 = vmatprep.mubr.bf16.mxu1 %v6097_v13  ;;  %v5740_v13 = vld [vmem:[#allocation5 + $0xd68] ss:$28 sps:$4 sm:$0xff]  }
 0x208   :  { %v4236_v54 = vadd.f32 %v6245_v53, %v4180_v62  ;;  %v4182_v34 = vmul.f32 %v5013_v30, %v6235_v22  ;;  %3831 = vmatpush1.bf16.msra.mxu0 %v5725_v50  ;;  %4972 = vmatprep.subr.bf16.mxu1 %v5733_v59 }
 0x209   :  { %v4259_v48 = vmax.f32 %v4235_v32, 0.0  ;;  %v4237_v11 = vadd.f32 %v6241_v41, %v4181_v46  ;;  %3832 = vmatprep.subr.bf16.mxu0 %v5732_v58 }
 0x20a   :  { %v4260_v63 = vmax.f32 %v4236_v54, 0.0  ;;  %v4238_v16 = vadd.f32 %v6245_v53, %v4182_v34  ;;  %v3350_v3 = vpop.f32.mrb[28].mxu0  ;;  %v5744_v53 = vld [vmem:[#allocation5 + $0xbb0] ss:$28 sps:$4 sm:$0xff]  }
 0x20b   :  { %4275 = vst [vmem:[#allocation12 + $0x20] sm:$0xff] %v4259_v48  ;;  %v4261_v2 = vmax.f32 %v4237_v11, 0.0  ;;  %v3351_v22 = vpop.f32.mrb[29].mxu0  ;;  %4973 = vmatpush3.bf16.msra.mxu1 %v5734_v8 }
 0x20c   :  { %4276 = vst [vmem:[#allocation12 + $0x28] sm:$0xff] %v4260_v63  ;;  %v4262_v51 = vmax.f32 %v4238_v16, 0.0  ;;  %3833 = vmatpush1.bf16.msra.mxu0 %v5730_v44  ;;  %v3352_v41 = vpop.f32.mrb[30].mxu0  ;;  %4974 = vmatprep.subr.bf16.mxu1 %v5738_v37 }
 0x20d   :  { %4277 = vst [vmem:[#allocation12 + $0x30] sm:$0xff] %v4261_v2  ;;  %3834 = vmatprep.subr.bf16.mxu0 %v5737_v52  ;;  %v3353_v6 = vpop.f32.mrb[31].mxu0 }
 0x20e   :  { %4278 = vst [vmem:[#allocation12 + $0x38] sm:$0xff] %v4262_v51  ;;  %4054 = vmatmul.mubr.bf16.gmra.mrb[72].mxu1 %v6103_v20  ;;  %v5750_v20 = vld [vmem:[#allocation5 + $0xdd8] ss:$28 sps:$4 sm:$0xff]  }
 0x20f   :  { %4975 = vmatpush3.bf16.msra.mxu1 %v5739_v27  ;;  %4061 = vmatprep.mubr.bf16.mxu1 %v6105_v28 }
 0x210   :  { %3835 = vmatpush1.bf16.msra.mxu0 %v5735_v25  ;;  %4976 = vmatprep.subr.bf16.mxu1 %v5743_v1 }
 0x211   :  { %3836 = vmatprep.subr.bf16.mxu0 %v5742_v61 }
 0x213   :  { %4977 = vmatpush3.bf16.msra.mxu1 %v5744_v53 }
 0x214   :  { %3837 = vmatpush1.bf16.msra.mxu0 %v5740_v13  ;;  %4978 = vmatprep.subr.bf16.mxu1 %v5748_v7 }
 0x215   :  { %3838 = vmatprep.subr.bf16.mxu0 %v5747_v29 }
 0x216   :  { %4062 = vmatmul.mubr.bf16.gmra.mrb[76].mxu1 %v6113_v35 }
 0x217   :  { %4979 = vmatpush3.bf16.msra.mxu1 %v5749_v10  ;;  %4102 = vmatprep.mubr.bf16.mxu1 %v6119_v45 }
 0x218   :  { %3839 = vmatpush1.bf16.msra.mxu0 %v5745_v26  ;;  %4980 = vmatprep.subr.bf16.mxu1 %v5753_v15 }
 0x219   :  { %3840 = vmatprep.subr.bf16.mxu0 %v5752_v14 }
 0x21b   :  { %4981 = vmatpush3.bf16.msra.mxu1 %v5754_v36 }
 0x21c   :  { %3841 = vmatpush1.bf16.msra.mxu0 %v5750_v20 }
 0x21e   :  { %4103 = vmatmul.mubr.bf16.vlgmr.msra.gmra.mrb[80].mxu1 %v6127_v47 }
 0x21f   :  { %3843 = vmatmul.mubr.bf16.vlgmr.msra.gmra.mrb[64].mxu0 %v6127_v47  ;;  %4110 = vmatprep.mubr.bf16.mxu1 %v6129_v56 }
 0x220   :  { %3848 = vmatprep.mubr.bf16.mxu0 %v6129_v56 }
 0x226   :  { %4111 = vmatmul.mubr.bf16.gmra.mrb[84].mxu1 %v6135_v0 }
 0x227   :  { %3849 = vmatmul.mubr.bf16.gmra.mrb[36].mxu0 %v6135_v0  ;;  %4118 = vmatprep.mubr.bf16.mxu1 %v6137_v9 }
 0x228   :  { %3858 = vmatprep.mubr.bf16.mxu0 %v6137_v9 }
 0x22e   :  { %4119 = vmatmul.mubr.bf16.gmra.mrb[88].mxu1 %v6143_v18 }
 0x22f   :  { %3859 = vmatmul.mubr.bf16.gmra.mrb[68].mxu0 %v6143_v18  ;;  %4126 = vmatprep.mubr.bf16.mxu1 %v6145_v24  ;;  %v4151_v18 = vsub.s32 3, %v6219_v5 }
 0x230   :  { %3864 = vmatprep.mubr.bf16.mxu0 %v6145_v24 }
 0x231   :  { %v4152_v24 = vrot.slane %v6224_v12, %v4151_v18 }
 0x232   :  { %v3649_v28 = vpop.f32.mrb[32].mxu0 }
 0x233   :  { %v3650_v35 = vpop.f32.mrb[33].mxu0 }
 0x234   :  { %v3651_v45 = vpop.f32.mrb[34].mxu0 }
 0x235   :  { %v3652_v47 = vpop.f32.mrb[35].mxu0 }
 0x236   :  { %4127 = vmatmul.mubr.bf16.gmra.mrb[92].mxu1 %v6151_v40 }
 0x237   :  { %3865 = vmatmul.mubr.bf16.gmra.mrb[44].mxu0 %v6151_v40  ;;  %v4208_v40 = vrot.slane %v6229_v42, %v4151_v18 }
 0x242   :  { %v3665_v56 = vpop.f32.mrb[40].mxu0 }
 0x243   :  { %v3666_v0 = vpop.f32.mrb[41].mxu0 }
 0x244   :  { %v3667_v17 = vpop.f32.mrb[42].mxu0 }
 0x245   :  { %v3668_v9 = vpop.f32.mrb[43].mxu0 }
 0x271   :  { %v3584_v21 = vpop.f32.mrb[16].mxu1 }
 0x272   :  { %v3714_v43 = vpop.f32.mrb[48].mxu0  ;;  %v3585_v23 = vpop.f32.mrb[17].mxu1 }
 0x273   :  { %v3715_v55 = vpop.f32.mrb[49].mxu0  ;;  %v3586_v33 = vpop.f32.mrb[18].mxu1 }
 0x274   :  { %v3716_v39 = vpop.f32.mrb[50].mxu0  ;;  %v4171_v50 = vmul.f32 %v4148_v19, %v3586_v33  ;;  %v3588_v57 = vpop.f32.mrb[19].mxu1 }
 0x275   :  { %v3717_v49 = vpop.f32.mrb[51].mxu0  ;;  %v4172_v60 = vmul.f32 %v4152_v24, %v3588_v57 }
 0x276   :  { %v4227_v38 = vadd.f32 %v4204_v31, %v4171_v50 }
 0x277   :  { %v4228_v58 = vadd.f32 %v4208_v40, %v4172_v60 }
 0x278   :  { %v4251_v59 = vmax.f32 %v4227_v38, 0.0 }
 0x279   :  { %v4252_v62 = vmax.f32 %v4228_v58, 0.0  ;;  %v3592_v30 = vpop.f32.mrb[20].mxu1 }
 0x27a   :  { %4280 = vst [vmem:[#allocation12 + $0x40] sm:$0xff] %v4251_v59  ;;  %v4173_v32 = vmul.f32 %v4148_v19, %v3592_v30  ;;  %v3594_v46 = vpop.f32.mrb[21].mxu1 }
 0x27b   :  { %4281 = vst [vmem:[#allocation12 + $0x48] sm:$0xff] %v4252_v62  ;;  %v4174_v54 = vmul.f32 %v4152_v24, %v3594_v46  ;;  %v3596_v34 = vpop.f32.mrb[22].mxu1 }
 0x27c   :  { %v4229_v44 = vadd.f32 %v4204_v31, %v4173_v32  ;;  %v3597_v8 = vpop.f32.mrb[23].mxu1 }
 0x27d   :  { %v4230_v48 = vadd.f32 %v4208_v40, %v4174_v54 }
 0x27e   :  { %v4253_v11 = vmax.f32 %v4229_v44, 0.0 }
 0x27f   :  { %v4254_v52 = vmax.f32 %v4230_v48, 0.0 }
 0x280   :  { %4282 = vst [vmem:[#allocation12 + $0x50] sm:$0xff] %v4253_v11 }
 0x281   :  { %4283 = vst [vmem:[#allocation12 + $0x58] sm:$0xff] %v4254_v52  ;;  %v3600_v37 = vpop.f32.mrb[24].mxu1 }
 0x282   :  { %v3730_v63 = vpop.f32.mrb[52].mxu0  ;;  %v3601_v16 = vpop.f32.mrb[25].mxu1 }
 0x283   :  { %v3731_v3 = vpop.f32.mrb[53].mxu0  ;;  %v3602_v2 = vpop.f32.mrb[26].mxu1 }
 0x284   :  { %v3732_v22 = vpop.f32.mrb[54].mxu0  ;;  %v4183_v51 = vmul.f32 %v4148_v19, %v3602_v2  ;;  %v3604_v25 = vpop.f32.mrb[27].mxu1 }
 0x285   :  { %v3733_v27 = vpop.f32.mrb[55].mxu0  ;;  %v4184_v41 = vmul.f32 %v4152_v24, %v3604_v25 }
 0x286   :  { %v4239_v61 = vadd.f32 %v4204_v31, %v4183_v51 }
 0x287   :  { %v4240_v1 = vadd.f32 %v4208_v40, %v4184_v41 }
 0x288   :  { %v4263_v6 = vmax.f32 %v4239_v61, 0.0 }
 0x289   :  { %v4264_v13 = vmax.f32 %v4240_v1, 0.0  ;;  %v3608_v53 = vpop.f32.mrb[28].mxu1 }
 0x28a   :  { %4284 = vst [vmem:[#allocation12 + $0x60] sm:$0xff] %v4263_v6  ;;  %v4185_v29 = vmul.f32 %v4148_v19, %v3608_v53  ;;  %v3610_v7 = vpop.f32.mrb[29].mxu1 }
 0x28b   :  { %4285 = vst [vmem:[#allocation12 + $0x68] sm:$0xff] %v4264_v13  ;;  %v4186_v26 = vmul.f32 %v4152_v24, %v3610_v7  ;;  %v3612_v10 = vpop.f32.mrb[30].mxu1 }
 0x28c   :  { %v4241_v14 = vadd.f32 %v4204_v31, %v4185_v29  ;;  %v3613_v15 = vpop.f32.mrb[31].mxu1 }
 0x28d   :  { %v4242_v20 = vadd.f32 %v4208_v40, %v4186_v26 }
 0x28e   :  { %v4265_v36 = vmax.f32 %v4241_v14, 0.0 }
 0x28f   :  { %v4266_v28 = vmax.f32 %v4242_v20, 0.0 }
 0x290   :  { %4286 = vst [vmem:[#allocation12 + $0x70] sm:$0xff] %v4265_v36 }
 0x291   :  { %4287 = vst [vmem:[#allocation12 + $0x78] sm:$0xff] %v4266_v28  ;;  %v4862_v35 = vpop.f32.mrb[32].mxu1 }
 0x292   :  { %v4863_v45 = vpop.f32.mrb[33].mxu1 }
 0x293   :  { %v4864_v47 = vadd.f32 %v4863_v45, %v4862_v35  ;;  %v4865_v56 = vpop.f32.mrb[34].mxu1 }
 0x294   :  { %v4866_v0 = vpop.f32.mrb[35].mxu1 }
 0x295   :  { %v4867_v17 = vadd.f32 %v4866_v0, %v4865_v56 }
 0x299   :  { %v4868_v9 = vpop.f32.mrb[36].mxu1 }
 0x29a   :  { %v4869_v4 = vpop.f32.mrb[37].mxu1 }
 0x29b   :  { %v4870_v18 = vadd.f32 %v4869_v4, %v4868_v9  ;;  %v4871_v19 = vpop.f32.mrb[38].mxu1 }
 0x29c   :  { %v4872_v21 = vpop.f32.mrb[39].mxu1 }
 0x29d   :  { %v4873_v24 = vadd.f32 %v4872_v21, %v4871_v19 }
 0x2a1   :  { %v4874_v43 = vpop.f32.mrb[40].mxu1 }
 0x2a2   :  { %v4875_v23 = vpop.f32.mrb[41].mxu1 }
 0x2a3   :  { %v4876_v31 = vadd.f32 %v4875_v23, %v4874_v43  ;;  %v4877_v55 = vpop.f32.mrb[42].mxu1 }
 0x2a4   :  { %v4878_v33 = vpop.f32.mrb[43].mxu1 }
 0x2a5   :  { %v4879_v40 = vadd.f32 %v4878_v33, %v4877_v55 }
 0x2a9   :  { %v4880_v39 = vpop.f32.mrb[44].mxu1 }
 0x2aa   :  { %v4881_v50 = vpop.f32.mrb[45].mxu1 }
 0x2ab   :  { %v4882_v57 = vadd.f32 %v4881_v50, %v4880_v39  ;;  %v4883_v49 = vpop.f32.mrb[46].mxu1 }
 0x2ac   :  { %v4884_v60 = vpop.f32.mrb[47].mxu1 }
 0x2ad   :  { %v4885_v38 = vadd.f32 %v4884_v60, %v4883_v49 }
 0x2b1   :  { %v4902_v58 = vpop.f32.mrb[48].mxu1 }
 0x2b2   :  { %v3779_v59 = vpop.f32.mrb[56].mxu0  ;;  %v4903_v62 = vpop.f32.mrb[49].mxu1 }
 0x2b3   :  { %v3780_v30 = vpop.f32.mrb[57].mxu0  ;;  %v4904_v32 = vadd.f32 %v4903_v62, %v4902_v58  ;;  %v4905_v46 = vpop.f32.mrb[50].mxu1 }
 0x2b4   :  { %v3781_v54 = vpop.f32.mrb[58].mxu0  ;;  %v4906_v34 = vpop.f32.mrb[51].mxu1 }
 0x2b5   :  { %v3782_v44 = vpop.f32.mrb[59].mxu0  ;;  %v3975_v8 = vadd.f32 %v4904_v32, %v4864_v47  ;;  %v4907_v48 = vadd.f32 %v4906_v34, %v4905_v46 }
 0x2b7   :  { %v3978_v11 = vadd.f32 %v4907_v48, %v4867_v17 }
 0x2b9   :  { %v4908_v52 = vpop.f32.mrb[52].mxu1 }
 0x2ba   :  { %v4909_v37 = vpop.f32.mrb[53].mxu1 }
 0x2bb   :  { %v4910_v63 = vadd.f32 %v4909_v37, %v4908_v52  ;;  %v4911_v16 = vpop.f32.mrb[54].mxu1 }
 0x2bc   :  { %v4912_v3 = vpop.f32.mrb[55].mxu1 }
 0x2bd   :  { %v3983_v2 = vadd.f32 %v4910_v63, %v4870_v18  ;;  %v4913_v22 = vadd.f32 %v4912_v3, %v4911_v16  ;;  %v4155_v16 = vsub.s32 4, %v6219_v5 }
 0x2bf   :  { %v3986_v51 = vadd.f32 %v4913_v22, %v4873_v24 }
 0x2c1   :  { %v4914_v25 = vpop.f32.mrb[56].mxu1 }
 0x2c2   :  { %v3795_v27 = vpop.f32.mrb[60].mxu0  ;;  %v4915_v41 = vpop.f32.mrb[57].mxu1 }
 0x2c3   :  { %v3796_v61 = vpop.f32.mrb[61].mxu0  ;;  %v4916_v1 = vadd.f32 %v4915_v41, %v4914_v25  ;;  %v4917_v6 = vpop.f32.mrb[58].mxu1 }
 0x2c4   :  { %v3797_v13 = vpop.f32.mrb[62].mxu0  ;;  %v4918_v53 = vpop.f32.mrb[59].mxu1 }
 0x2c5   :  { %v3798_v29 = vpop.f32.mrb[63].mxu0  ;;  %v3991_v7 = vadd.f32 %v4916_v1, %v4876_v31  ;;  %v4919_v26 = vadd.f32 %v4918_v53, %v4917_v6  ;;  %v4156_v1 = vrot.slane %v6224_v12, %v4155_v16  ;;  %v6316_v53 = vrot.slane %v6229_v42, %v4155_v16 }
 0x2c7   :  { %v3994_v10 = vadd.f32 %v4919_v26, %v4879_v40 }
 0x2c9   :  { %v4920_v14 = vpop.f32.mrb[60].mxu1 }
 0x2ca   :  { %v4921_v15 = vpop.f32.mrb[61].mxu1 }
 0x2cb   :  { %v4922_v20 = vadd.f32 %v4921_v15, %v4920_v14  ;;  %v4923_v36 = vpop.f32.mrb[62].mxu1 }
 0x2cc   :  { %v4924_v28 = vpop.f32.mrb[63].mxu1 }
 0x2cd   :  { %v3999_v35 = vadd.f32 %v4922_v20, %v4882_v57  ;;  %v4925_v45 = vadd.f32 %v4924_v28, %v4923_v36 }
 0x2cf   :  { %v4002_v47 = vadd.f32 %v4925_v45, %v4885_v38 }
 0x2d1   :  { %v4942_v56 = vpop.f32.mrb[64].mxu1 }
 0x2d2   :  { %v4943_v0 = vpop.f32.mrb[65].mxu1 }
 0x2d3   :  { %v4944_v17 = vadd.f32 %v4943_v0, %v4942_v56  ;;  %v4945_v9 = vpop.f32.mrb[66].mxu1 }
 0x2d4   :  { %v4946_v4 = vpop.f32.mrb[67].mxu1 }
 0x2d5   :  { %v4040_v18 = vadd.f32 %v4944_v17, %v3975_v8  ;;  %v4947_v19 = vadd.f32 %v4946_v4, %v4945_v9 }
 0x2d7   :  { %v4043_v21 = vadd.f32 %v4947_v19, %v3978_v11 }
 0x2d9   :  { %v4948_v24 = vpop.f32.mrb[68].mxu1 }
 0x2da   :  { %v4949_v43 = vpop.f32.mrb[69].mxu1 }
 0x2db   :  { %v4950_v23 = vadd.f32 %v4949_v43, %v4948_v24  ;;  %v4951_v31 = vpop.f32.mrb[70].mxu1 }
 0x2dc   :  { %v4952_v55 = vpop.f32.mrb[71].mxu1 }
 0x2dd   :  { %v4048_v33 = vadd.f32 %v4950_v23, %v3983_v2  ;;  %v4953_v40 = vadd.f32 %v4952_v55, %v4951_v31 }
 0x2df   :  { %v4051_v39 = vadd.f32 %v4953_v40, %v3986_v51  ;;  %v4159_v51 = vsub.s32 5, %v6219_v5 }
 0x2e1   :  { %v4954_v50 = vpop.f32.mrb[72].mxu1  ;;  %v6313_v13 = vrot.slane %v6224_v12, %v4159_v51 }
 0x2e2   :  { %v4955_v57 = vpop.f32.mrb[73].mxu1 }
 0x2e3   :  { %v4956_v49 = vadd.f32 %v4955_v57, %v4954_v50  ;;  %v4957_v60 = vpop.f32.mrb[74].mxu1 }
 0x2e4   :  { %v4958_v38 = vpop.f32.mrb[75].mxu1 }
 0x2e5   :  { %v6301_v58 = vadd.f32 %v4956_v49, %v3991_v7  ;;  %v4959_v59 = vadd.f32 %v4958_v38, %v4957_v60 }
 0x2e7   :  { %v6303_v62 = vadd.f32 %v4959_v59, %v3994_v10  ;;  %v6319_v10 = vrot.slane %v6229_v42, %v4159_v51 }
 0x2e9   :  { %v4960_v30 = vpop.f32.mrb[76].mxu1 }
 0x2ea   :  { %v4961_v32 = vpop.f32.mrb[77].mxu1 }
 0x2eb   :  { %v4962_v46 = vadd.f32 %v4961_v32, %v4960_v30  ;;  %v4963_v54 = vpop.f32.mrb[78].mxu1 }
 0x2ec   :  { %v4964_v34 = vpop.f32.mrb[79].mxu1 }
 0x2ed   :  { %v6305_v44 = vadd.f32 %v4962_v46, %v3999_v35  ;;  %v4965_v8 = vadd.f32 %v4964_v34, %v4963_v54 }
 0x2ef   :  { %v6307_v48 = vadd.f32 %v4965_v8, %v4002_v47 }
 0x2f1   :  { %v4982_v11 = vpop.f32.mrb[80].mxu1 }
 0x2f2   :  { %v3844_v52 = vpop.f32.mrb[64].mxu0  ;;  %v4983_v37 = vpop.f32.mrb[81].mxu1 }
 0x2f3   :  { %v3845_v63 = vpop.f32.mrb[65].mxu0  ;;  %v4984_v3 = vadd.f32 %v4983_v37, %v4982_v11  ;;  %v4985_v2 = vpop.f32.mrb[82].mxu1 }
 0x2f4   :  { %v3846_v22 = vpop.f32.mrb[66].mxu0  ;;  %v4986_v25 = vpop.f32.mrb[83].mxu1 }
 0x2f5   :  { %v3847_v27 = vpop.f32.mrb[67].mxu0  ;;  %v4105_v41 = vadd.f32 %v4984_v3, %v4040_v18  ;;  %v4987_v61 = vadd.f32 %v4986_v25, %v4985_v2 }
 0x2f7   :  { %v4108_v6 = vadd.f32 %v4987_v61, %v4043_v21 }
 0x2f9   :  { %v4297_v29 = vadd.f32 %v4108_v6, %v4105_v41  ;;  %v4988_v26 = vpop.f32.mrb[84].mxu1 }
 0x2fa   :  { %v3850_v7 = vpop.f32.mrb[36].mxu0  ;;  %v4989_v15 = vpop.f32.mrb[85].mxu1 }
 0x2fb   :  { %v4175_v5 = vmul.f32 %v4156_v1, %v3850_v7  ;;  %v3852_v14 = vpop.f32.mrb[37].mxu0  ;;  %v4990_v36 = vadd.f32 %v4989_v15, %v4988_v26  ;;  %v4991_v35 = vpop.f32.mrb[86].mxu1 }
 0x2fc   :  { %v4176_v20 = vmul.f32 %v6313_v13, %v3852_v14  ;;  %v3854_v28 = vpop.f32.mrb[38].mxu0  ;;  %v4992_v56 = vpop.f32.mrb[87].mxu1 }
 0x2fd   :  { %v4231_v12 = vadd.f32 %v6316_v53, %v4175_v5  ;;  %v4177_v45 = vmul.f32 %v4156_v1, %v3854_v28  ;;  %v3856_v47 = vpop.f32.mrb[39].mxu0  ;;  %v4113_v17 = vadd.f32 %v4990_v36, %v4048_v33  ;;  %v4993_v42 = vadd.f32 %v4992_v56, %v4991_v35 }
 0x2fe   :  { %v4232_v0 = vadd.f32 %v6319_v10, %v4176_v20  ;;  %v4178_v9 = vmul.f32 %v6313_v13, %v3856_v47 }
 0x2ff   :  { %v4255_v4 = vmax.f32 %v4231_v12, 0.0  ;;  %v4233_v18 = vadd.f32 %v6316_v53, %v4177_v45  ;;  %v4298_v21 = vadd.f32 %v4297_v29, %v4113_v17  ;;  %v4116_v43 = vadd.f32 %v4993_v42, %v4051_v39 }
 0x300   :  { %v4256_v19 = vmax.f32 %v4232_v0, 0.0  ;;  %v4234_v24 = vadd.f32 %v6319_v10, %v4178_v9 }
 0x301   :  { %4289 = vst [vmem:[#allocation12 + $0x80] sm:$0xff] %v4255_v4  ;;  %v4257_v23 = vmax.f32 %v4233_v18, 0.0  ;;  %v4299_v55 = vadd.f32 %v4298_v21, %v4116_v43  ;;  %v4994_v40 = vpop.f32.mrb[88].mxu1 }
 0x302   :  { %4290 = vst [vmem:[#allocation12 + $0x88] sm:$0xff] %v4256_v19  ;;  %v4258_v31 = vmax.f32 %v4234_v24, 0.0  ;;  %v3860_v50 = vpop.f32.mrb[68].mxu0  ;;  %v4995_v33 = vpop.f32.mrb[89].mxu1 }
 0x303   :  { %4291 = vst [vmem:[#allocation12 + $0x90] sm:$0xff] %v4257_v23  ;;  %v3861_v57 = vpop.f32.mrb[69].mxu0  ;;  %v4996_v49 = vadd.f32 %v4995_v33, %v4994_v40  ;;  %v4997_v60 = vpop.f32.mrb[90].mxu1  ;;  %v4300_v54 = vrot.slane %v4299_v55, 4 }
 0x304   :  { %4292 = vst [vmem:[#allocation12 + $0x98] sm:$0xff] %v4258_v31  ;;  %v3862_v38 = vpop.f32.mrb[70].mxu0  ;;  %v4998_v59 = vpop.f32.mrb[91].mxu1 }
 0x305   :  { %v3863_v30 = vpop.f32.mrb[71].mxu0  ;;  %v4121_v32 = vadd.f32 %v4996_v49, %v6301_v58  ;;  %v4999_v46 = vadd.f32 %v4998_v59, %v4997_v60  ;;  %v4301_v51 = vadd.f32 %v4300_v54, %v4299_v55 }
 0x307   :  { %v4124_v39 = vadd.f32 %v4999_v46, %v6303_v62  ;;  %v4302_v36 = vrot.slane %v4301_v51, 2 }
 0x309   :  { %v4306_v34 = vadd.f32 %v4124_v39, %v4121_v32  ;;  %v5000_v11 = vpop.f32.mrb[92].mxu1 }
 0x30a   :  { %v3866_v8 = vpop.f32.mrb[44].mxu0  ;;  %v5001_v63 = vpop.f32.mrb[93].mxu1 }
 0x30b   :  { %v4187_v52 = vmul.f32 %v4156_v1, %v3866_v8  ;;  %v3868_v37 = vpop.f32.mrb[45].mxu0  ;;  %v5002_v3 = vadd.f32 %v5001_v63, %v5000_v11  ;;  %v5003_v22 = vpop.f32.mrb[94].mxu1 }
 0x30c   :  { %v4188_v16 = vmul.f32 %v6313_v13, %v3868_v37  ;;  %v3870_v2 = vpop.f32.mrb[46].mxu0  ;;  %v5004_v41 = vpop.f32.mrb[95].mxu1 }
 0x30d   :  { %v4243_v25 = vadd.f32 %v6316_v53, %v4187_v52  ;;  %v4189_v27 = vmul.f32 %v4156_v1, %v3870_v2  ;;  %v3872_v58 = vpop.f32.mrb[47].mxu0  ;;  %v4129_v61 = vadd.f32 %v5002_v3, %v6305_v44  ;;  %v5005_v29 = vadd.f32 %v5004_v41, %v5003_v22 }
 0x30e   :  { %v4244_v62 = vadd.f32 %v6319_v10, %v4188_v16  ;;  %v4190_v6 = vmul.f32 %v6313_v13, %v3872_v58 }
 0x30f   :  { %v4267_v7 = vmax.f32 %v4243_v25, 0.0  ;;  %v4245_v26 = vadd.f32 %v6316_v53, %v4189_v27  ;;  %v4307_v14 = vadd.f32 %v4306_v34, %v4129_v61  ;;  %v4132_v1 = vadd.f32 %v5005_v29, %v6307_v48 }
 0x310   :  { %v4268_v5 = vmax.f32 %v4244_v62, 0.0  ;;  %v4246_v15 = vadd.f32 %v6319_v10, %v4190_v6 }
 0x311   :  { %4293 = vst [vmem:[#allocation12 + $0xa0] sm:$0xff] %v4267_v7  ;;  %v4269_v20 = vmax.f32 %v4245_v26, 0.0  ;;  %v4308_v28 = vadd.f32 %v4307_v14, %v4132_v1 }
 0x312   :  { %4294 = vst [vmem:[#allocation12 + $0xa8] sm:$0xff] %v4268_v5  ;;  %v4270_v44 = vmax.f32 %v4246_v15, 0.0 }
 0x313   :  { %4295 = vst [vmem:[#allocation12 + $0xb0] sm:$0xff] %v4269_v20  ;;  %v4309_v13 = vrot.slane %v4308_v28, 4 }
 0x314   :  { %4296 = vst [vmem:[#allocation12 + $0xb8] sm:$0xff] %v4270_v44 }
 0x315   :  { %5876 = shalt.err (!%p5873_p2)
}
 0x316   :  { %s5877_s12 = scalar_lea.hbm %s6367_s6, 3072 }
 0x317   :  { %p5878_p3 = scmp.ne.s32.totalorder %s6367_s6, %s5877_s12  ;;  %p5881_p4 = scmp.lt.u32.totalorder %s5877_s12, %s6367_s6 }
 0x319   :  { %p5883_p5 = pnand %p5881_p4, %p5878_p3 }
 0x31b   :  { %5886 = shalt.err (!%p5883_p5)
}
 0x31c   :  { %s5929_s18 = smov 256   ;;  %s5930_s19 = smov 16   ;;  %v4303_v48 = vadd.f32 %v4302_v36, %v4301_v51  ;;  %v4310_v53 = vadd.f32 %v4309_v13, %v4308_v28  ;;  %v4845_v0 = vld [vmem:[#allocation10] ss:$0 sm:$0xff]  ;;  %vm4327_vm0 = vcmask 1041409   ;;  %vm4330_vm1 = vcmask 205824  }
 0x31d   :  { %4353 = dma.vmem_to_hbm [thread:$0]  %s4348_s8, 3072, %s6367_s6, [#allocation13], %s5929_s18, %s5929_s18, %s5930_s19  }
 0x31e   :  { %v4311_v10 = vrot.slane %v4310_v53, 2  ;;  %v4304_v35 = vrot.slane %v4303_v48, 1  ;;  %s5931_s1 = smov [#allocation11]  }
 0x31f   :  { %s4338_s0 = sshll.u32 %s5931_s1, 4  ;;  %s4339_s0 = int_to_ptr.vmem [resolvable:$true] %s4338_s0 }
 0x320   :  { %v4312_v12 = vadd.f32 %v4311_v10, %v4310_v53  ;;  %v4305_v56 = vadd.f32 %v4304_v35, %v4303_v48  ;;  %s5887_s6 = scalar_lea.vmem %s4339_s0, 32  ;;  %p5892_p7 = scmp.lt.s32.totalorder %s4339_s0, %s4339_s0 }
 0x321   :  { %p5888_p6 = scmp.ne.s32.totalorder %s4339_s0, %s5887_s6  ;;  %p5893_p8 = scmp.lt.s32.totalorder %s5887_s6, %s5887_s6 }
 0x322   :  { %v4313_v45 = vrot.slane %v4312_v12, 1  ;;  %v4322_v9 = vadd.f32 %v4845_v0, %v4305_v56 }
 0x323   :  { %p5894_p9 = por %p5893_p8, %p5892_p7 }
 0x324   :  { %v4314_v47 = vadd.f32 %v4313_v45, %v4312_v12 }
 0x325   :  { %p5895_p10 = pnand %p5894_p9, %p5888_p6 }
 0x326   :  { %v4323_v17 = vadd.f32 %v4845_v0, %v4314_v47 }
 0x328   :  { %v4326_v42 = vrot.slane %v4323_v17, 7 }
 0x32a   :  { %v4328_v4 = vsel %vm4327_vm0, %v4326_v42, %v4322_v9 }
 0x32b   :  { %4331 = vst.msk [vmem:[#allocation11] sm:$0x3] %vm4330_vm1, %v4328_v4 }
 0x32c   :  { %5898 = shalt.err (!%p5895_p10)
}
 0x32d   :  { %s5899_s23 = scalar_lea.hbm %s6366_s5, 32 }
 0x32e   :  { %p5900_p11 = scmp.ne.s32.totalorder %s6366_s5, %s5899_s23  ;;  %p5903_p12 = scmp.lt.u32.totalorder %s5899_s23, %s6366_s5 }
 0x330   :  { %p5905_p13 = pnand %p5903_p12, %p5900_p11 }
 0x332   :  { %5908 = shalt.err (!%p5905_p13)
}
 0x333   :  { %4341 = dma.vmem_to_hbm [thread:$0]  %s4339_s0, 32, %s6366_s5, [#allocation4]  }
 0x334   :  { %5915 = dma.done.wait [#allocation4], 32  }
 0x335   :  { %5916 = vsyncadd [#allocation4], 4294967264 }
 0x336   :  { %5917 = dma.done.wait [#allocation13], 3072  }
 0x337   :  { %5918 = vsyncadd [#allocation13], 4294964224 }
 0x338   :  { %4360 = vsyncpa [#allocation3], 1 }
 0x339   :  { %4361 = vsyncpa [#allocation6], 1 }
 0x33a   :  { %4362 = vsyncpa [#allocation9], 1 }
 0x33b   :  { %4363 = vsyncpa [#allocation4], 1 }
 0x33c   :  { %4364 = vsyncpa [#allocation13], 1 }

</bundles_post_ra>
